<compile_context>
chip_gen: v7x
topology: tpu7x:2x2x1
jax: 0.10.0
libtpu: 0.0.40
codegen_flags: <defaults>
</compile_context>

<pallas_src>
import functools

import jax
import jax.numpy as jnp
from jax.experimental import pallas as pl
from jax.experimental.pallas import tpu as pltpu


_INV_SQRT2 = 0.7071067811865476
_SQRT_2_OVER_PI = 0.7978845608028654


def _round_up(n, m):
    return ((n + m - 1) // m) * m


def _gelu_exact(x):
    # torch.nn.functional.gelu default ('none'): 0.5*x*(1+erf(x/sqrt(2)))
    return 0.5 * x * (1.0 + jax.lax.erf(x * jnp.float32(_INV_SQRT2)))


def _gelu_tanh(x):
    # torch 'tanh' approximation; tanh runs on the EUP (frees VALU slots on v5e).
    return 0.5 * x * (1.0 + jnp.tanh(_SQRT_2_OVER_PI * (x + 0.044715 * x * x * x)))


def _slab_layout(S, A, H):
    """Row/col layout of the packed parameter slab (all row offsets 8-aligned)."""
    lane = max(128, _round_up(2 * H, 128))
    lay = {"lane": lane, "d_pad": _round_up(S + A, 8)}
    r = 0
    lay["w1"] = r; r += lay["d_pad"]   # fused [W1_state; W1_action], cols 0:H
    lay["bias"] = r; r += 8            # b1,b2,b3,b_branch,b_ls2,b_head (6 rows)
    lay["w2"] = r; r += lane           # W2        rows 0:H,  cols 0:H
    lay["w3"] = r; r += lane           # W3        rows 0:H,  cols 0:H
    lay["wbr"] = r; r += lane          # Wmu2 [0:H,0:H] | Wls1 [0:H,H:2H]
    lay["ws2"] = r; r += lane          # Wls2      rows H:2H, cols H:2H
    lay["whd"] = r; r += lane          # Wmu3 col0 rows 0:H | Wls3 col1 rows H:2H
    lay["rows"] = r
    return lay


def pack_params(params, S, A, H):
    """Pack 9 (W[in,out], b[out]) pairs into one zero-padded f32 slab.

    params order: linear1, linear2, linear3, linear_mu_1, linear_mu_2,
    linear_mu_3, linear_log_sigma_1, linear_log_sigma_2, linear_log_sigma_3.
    Weights are pre-transposed relative to torch (in_features, out_features).
    In real training, pack once per weight update and reuse across steps.
    """
    lay = _slab_layout(S, A, H)
    lane = lay["lane"]

    (w1, b1), (w2, b2), (w3, b3), (_wm1, _bm1), (wm2, bm2), (wm3, bm3), \
        (ws1, bs1), (ws2, bs2), (ws3, bs3) = params
    # _wm1/_bm1 (linear_mu_1) are dead in the original forward (overwritten).

    slab = jnp.zeros((lay["rows"], lane), jnp.float32)

    def put(s, r0, c0, v):
        v = jnp.asarray(v, jnp.float32)
        if v.ndim == 1:
            v = v[None, :]
        return jax.lax.dynamic_update_slice(s, v, (r0, c0))

    slab = put(slab, lay["w1"], 0, w1)          # (S+A, H), padded rows stay 0
    slab = put(slab, lay["bias"] + 0, 0, b1)
    slab = put(slab, lay["bias"] + 1, 0, b2)
    slab = put(slab, lay["bias"] + 2, 0, b3)
    slab = put(slab, lay["bias"] + 3, 0, bm2)   # branch bias, cols [0,H)
    slab = put(slab, lay["bias"] + 3, H, bs1)   # branch bias, cols [H,2H)
    slab = put(slab, lay["bias"] + 4, H, bs2)   # ls2 bias,    cols [H,2H)
    slab = put(slab, lay["bias"] + 5, 0, bm3)   # head bias,   col 0
    slab = put(slab, lay["bias"] + 5, 1, bs3)   # head bias,   col 1
    slab = put(slab, lay["w2"], 0, w2)
    slab = put(slab, lay["w3"], 0, w3)
    slab = put(slab, lay["wbr"], 0, wm2)
    slab = put(slab, lay["wbr"], H, ws1)
    slab = put(slab, lay["ws2"] + H, H, ws2)
    slab = put(slab, lay["whd"], 0, wm3)
    slab = put(slab, lay["whd"] + H, 1, ws3)
    return slab, lay


def _critic_kernel(x_ref, slab_ref, out_ref, *, H, lay,
                   log_sigma_min, log_sigma_max, use_bf16, use_tanh_gelu):
    lane = lay["lane"]
    f32 = jnp.float32
    gelu = _gelu_tanh if use_tanh_gelu else _gelu_exact

    def wrows(off, n):                  # static, 8-aligned slice of the slab
        return slab_ref[off:off + n, :]

    def brow(i):                        # one bias row, broadcast over batch
        r = lay["bias"] + i
        return slab_ref[r:r + 1, :]

    if use_bf16:
        def dot(a, w):                  # single-pass bf16 MXU, f32 accumulation
            return jnp.dot(a.astype(jnp.bfloat16), w.astype(jnp.bfloat16),
                           preferred_element_type=f32)
    else:
        def dot(a, w):
            return jnp.dot(a, w, preferred_element_type=f32)

    xin = x_ref[...]                    # (TB, Dp) = [state | action | 0-pad]

    # trunk: 3 x (linear -> gelu); activations stay lane-wide, content in cols [0,H)
    x = gelu(dot(xin, wrows(lay["w1"], lay["d_pad"])) + brow(0))
    x = gelu(dot(x, wrows(lay["w2"], lane)) + brow(1))
    x = gelu(dot(x, wrows(lay["w3"], lane)) + brow(2))

    # fused branch entry: cols [0,H) = gelu(linear_mu_2(x)),
    #                     cols [H,2H) = gelu(linear_log_sigma_1(x))
    # (linear_mu_1 is dead in the original forward -> skipped; output identical)
    br = gelu(dot(x, wrows(lay["wbr"], lane)) + brow(3))

    # log_sigma 2nd layer: reads cols [H,2H), writes cols [H,2H); rest stays 0
    ls2 = gelu(dot(br, wrows(lay["ws2"], lane)) + brow(4))

    # fused heads: col 0 = linear_mu_3(mu_hidden), col 1 = linear_log_sigma_3(ls_hidden2)
    col = jax.lax.broadcasted_iota(jnp.int32, (br.shape[0], lane), 1)
    head_in = jnp.where(col < H, br, ls2)
    head = dot(head_in, wrows(lay["whd"], lane)) + brow(5)

    # trimmed epilogue: clip/exp/select only on the 2 output lanes
    h2 = head[:, 0:2]
    col2 = jax.lax.broadcasted_iota(jnp.int32, h2.shape, 1)
    sig = jnp.exp(jnp.clip(h2, f32(log_sigma_min), f32(log_sigma_max)))
    out_ref[...] = jnp.where(col2 == 1, sig, h2).astype(out_ref.dtype)


def distributional_critic_forward(state, action, params,
                                  log_sigma_min=-0.1, log_sigma_max=5.0,
                                  use_bf16=True, use_tanh_gelu=False,
                                  block_batch=1024):
    """state: (B, S), action: (B, A) -> (mu (B,1), sigma (B,1)), float32."""
    state = jnp.asarray(state, jnp.float32)
    action = jnp.asarray(action, jnp.float32)
    B, S = state.shape
    A = action.shape[1]
    H = params[1][0].shape[0]            # linear2 in_features == layer_neurons

    slab, lay = pack_params(params, S, A, H)
    D, Dp = S + A, lay["d_pad"]

    # Batch tiling: pad B to an exact multiple of TB (no partial blocks) and
    # keep >= 2 grid blocks when possible so v7x can use both TensorCores.
    B8 = _round_up(B, 8)
    nblk = 1 if B8 < 16 else max(2, pl.cdiv(B8, block_batch))
    TB = _round_up(pl.cdiv(B8, nblk), 8)
    nblk = pl.cdiv(B8, TB)
    B_pad = nblk * TB

    # Wrapper-side concat + pad (tiny, fused by XLA): layer 1 becomes a single
    # lane-dense (TB, Dp) @ (Dp, 128) MXU pass with an 8-aligned K slice.
    x_in = jnp.concatenate([state, action], axis=1)
    if B_pad != B or Dp != D:
        x_in = jnp.pad(x_in, ((0, B_pad - B), (0, Dp - D)))

    kernel = functools.partial(
        _critic_kernel, H=H, lay=lay,
        log_sigma_min=float(log_sigma_min), log_sigma_max=float(log_sigma_max),
        use_bf16=use_bf16, use_tanh_gelu=use_tanh_gelu)

    def call(slab_spec):
        return pl.pallas_call(
            kernel,
            out_shape=jax.ShapeDtypeStruct((B_pad, 2), jnp.float32),
            grid=(nblk,),
            in_specs=[
                pl.BlockSpec((TB, Dp), lambda i: (i, 0)),
                slab_spec,               # resident across the whole grid
            ],
            out_specs=pl.BlockSpec((TB, 2), lambda i: (i, 0)),
            compiler_params=pltpu.CompilerParams(
                dimension_semantics=("parallel",)),
        )(x_in, slab)

    try:
        # Constant index_map -> single-buffer the slab (saves a ~340 KB copy).
        out = call(pl.BlockSpec(slab.shape, lambda i: (0, 0),
                                pipeline_mode=pl.Buffered(1)))
    except Exception:
        # Fallback if single-buffering of this operand is not accepted.
        out = call(pl.BlockSpec(slab.shape, lambda i: (0, 0)))

    return out[:B, 0:1], out[:B, 1:2]


def _reference_forward(state, action, params, log_sigma_min=-0.1, log_sigma_max=5.0):
    """Pure-JAX f32 reference mirroring the PyTorch forward (incl. dead linear_mu_1)."""
    (w1, b1), (w2, b2), (w3, b3), _, (wm2, bm2), (wm3, bm3), \
        (ws1, bs1), (ws2, bs2), (ws3, bs3) = params
    hp = jax.lax.Precision.HIGHEST
    lin = lambda x, w, b: jnp.dot(x, w, precision=hp) + b
    x = jnp.concatenate([state, action], axis=1)
    x = _gelu_exact(lin(x, w1, b1))
    x = _gelu_exact(lin(x, w2, b2))
    x = _gelu_exact(lin(x, w3, b3))
    mu = _gelu_exact(lin(x, wm2, bm2))
    mu = lin(mu, wm3, bm3)
    ls = _gelu_exact(lin(x, ws1, bs1))
    ls = _gelu_exact(lin(ls, ws2, bs2))
    ls = lin(ls, ws3, bs3)
    ls = jnp.clip(ls, log_sigma_min, log_sigma_max)
    return mu, jnp.exp(ls)


def init_linear(key, fan_in, fan_out):
    """Mimics torch.nn.Linear default init, weight stored as (in, out)."""
    kw, kb = jax.random.split(key)
    bound = 1.0 / float(fan_in) ** 0.5
    w = jax.random.uniform(kw, (fan_in, fan_out), jnp.float32, -bound, bound)
    b = jax.random.uniform(kb, (fan_out,), jnp.float32, -bound, bound)
    return w, b


if __name__ == "__main__":
    # Shapes consistent with the module: input_shape=(12,), action dim 4, layer_neurons=32
    B, S, A, H = 8, 12, 4, 32
    D = S + A

    key = jax.random.PRNGKey(0)
    keys = jax.random.split(key, 13)
    params = [
        init_linear(keys[0], D, H),   # linear1
        init_linear(keys[1], H, H),   # linear2
        init_linear(keys[2], H, H),   # linear3
        init_linear(keys[3], H, H),   # linear_mu_1 (dead in original forward)
        init_linear(keys[4], H, H),   # linear_mu_2
        init_linear(keys[5], H, 1),   # linear_mu_3
        init_linear(keys[6], H, H),   # linear_log_sigma_1
        init_linear(keys[7], H, H),   # linear_log_sigma_2
        init_linear(keys[8], H, 1),   # linear_log_sigma_3
    ]
    state = jax.random.normal(keys[9], (B, S), jnp.float32)
    action = jax.random.normal(keys[10], (B, A), jnp.float32)

    mu_ref, sigma_ref = _reference_forward(state, action, params)

    # Default (bf16 MXU) path.
    mu, sigma = distributional_critic_forward(state, action, params)
    jax.block_until_ready((mu, sigma))
    assert mu.shape == (B, 1) and sigma.shape == (B, 1)
    assert bool(jnp.all(sigma > 0.0))
    assert bool(jnp.allclose(mu, mu_ref, rtol=3e-2, atol=3e-2)), \
        f"mu (bf16) mismatch: {float(jnp.max(jnp.abs(mu - mu_ref)))}"
    assert bool(jnp.allclose(sigma, sigma_ref, rtol=3e-2, atol=3e-2)), \
        f"sigma (bf16) mismatch: {float(jnp.max(jnp.abs(sigma - sigma_ref)))}"

    # Exact f32 path stays within tight tolerance of the reference.
    mu32, sigma32 = distributional_critic_forward(state, action, params, use_bf16=False)
    jax.block_until_ready((mu32, sigma32))
    assert bool(jnp.allclose(mu32, mu_ref, rtol=1e-3, atol=1e-3)), \
        f"mu (f32) mismatch: {float(jnp.max(jnp.abs(mu32 - mu_ref)))}"
    assert bool(jnp.allclose(sigma32, sigma_ref, rtol=1e-3, atol=1e-3)), \
        f"sigma (f32) mismatch: {float(jnp.max(jnp.abs(sigma32 - sigma_ref)))}"

    # Non-multiple-of-8 batch: exercises batch padding + the >=2-block parallel grid.
    B2 = 20
    state2 = jax.random.normal(keys[11], (B2, S), jnp.float32)
    action2 = jax.random.normal(keys[12], (B2, A), jnp.float32)
    mu2, sigma2 = distributional_critic_forward(state2, action2, params)
    jax.block_until_ready((mu2, sigma2))
    mu2_ref, sigma2_ref = _reference_forward(state2, action2, params)
    assert mu2.shape == (B2, 1) and sigma2.shape == (B2, 1)
    assert bool(jnp.allclose(mu2, mu2_ref, rtol=3e-2, atol=3e-2)), \
        f"mu (padded batch) mismatch: {float(jnp.max(jnp.abs(mu2 - mu2_ref)))}"
    assert bool(jnp.allclose(sigma2, sigma2_ref, rtol=3e-2, atol=3e-2)), \
        f"sigma (padded batch) mismatch: {float(jnp.max(jnp.abs(sigma2 - sigma2_ref)))}"

    print("KERNEL_OK")
</pallas_src>

<mosaic_0001>
module attributes {stable_mosaic.version = 11 : i64} {
  func.func @_critic_kernel(%arg0: i32, %arg1: memref<8x16xf32, #tpu.memory_space<vmem>>, %arg2: memref<664x128xf32, #tpu.memory_space<vmem>>, %arg3: memref<8x2xf32, #tpu.memory_space<vmem>>) attributes {dimension_semantics = [#tpu.dimension_semantics<parallel>], iteration_bounds = array<i64: 1>, scalar_prefetch = 0 : i64, scratch_operands = 0 : i64, tpu.core_type = #tpu.core_type<tc>, window_params = [{transform_indices = @transform_0, window_bounds = array<i64: 8, 16>}, {pipeline_mode = #tpu.pipeline_mode<synchronous>, transform_indices = @transform_1, window_bounds = array<i64: 664, 128>}, {transform_indices = @transform_2, window_bounds = array<i64: 8, 2>}]} {
    %c0 = arith.constant 0 : index
    %c0_0 = arith.constant 0 : index
    %0 = vector.load %arg1[%c0, %c0_0] : memref<8x16xf32, #tpu.memory_space<vmem>>, vector<8x16xf32>
    %c0_1 = arith.constant 0 : index
    %c0_2 = arith.constant 0 : index
    %1 = vector.load %arg2[%c0_1, %c0_2] : memref<664x128xf32, #tpu.memory_space<vmem>>, vector<16x128xf32>
    %2 = arith.truncf %0 : vector<8x16xf32> to vector<8x16xbf16>
    %3 = arith.truncf %1 : vector<16x128xf32> to vector<16x128xbf16>
    %cst = arith.constant dense<0.000000e+00> : vector<8x128xf32>
    %4 = tpu.matmul %2, %3, %cst {dimension_numbers = #tpu.dot_dimension_numbers<[1], [0], [0], [1], [0, 0, 1, 1], [], []>} : vector<8x16xbf16>, vector<16x128xbf16>, vector<8x128xf32> -> vector<8x128xf32>
    %c16 = arith.constant 16 : index
    %c0_3 = arith.constant 0 : index
    %5 = vector.load %arg2[%c16, %c0_3] : memref<664x128xf32, #tpu.memory_space<vmem>>, vector<1x128xf32>
    %6 = vector.broadcast %5 : vector<1x128xf32> to vector<8x128xf32>
    %7 = arith.addf %4, %6 : vector<8x128xf32>
    %cst_4 = arith.constant 5.000000e-01 : f32
    %8 = vector.broadcast %cst_4 : f32 to vector<8x128xf32>
    %9 = arith.mulf %8, %7 : vector<8x128xf32>
    %cst_5 = arith.constant 0.707106769 : f32
    %10 = vector.broadcast %cst_5 : f32 to vector<8x128xf32>
    %11 = arith.mulf %7, %10 : vector<8x128xf32>
    %12 = math.erf %11 : vector<8x128xf32>
    %cst_6 = arith.constant 1.000000e+00 : f32
    %13 = vector.broadcast %cst_6 : f32 to vector<8x128xf32>
    %14 = arith.addf %13, %12 : vector<8x128xf32>
    %15 = arith.mulf %9, %14 : vector<8x128xf32>
    %c24 = arith.constant 24 : index
    %c0_7 = arith.constant 0 : index
    %16 = vector.load %arg2[%c24, %c0_7] : memref<664x128xf32, #tpu.memory_space<vmem>>, vector<128x128xf32>
    %17 = arith.truncf %15 : vector<8x128xf32> to vector<8x128xbf16>
    %18 = arith.truncf %16 : vector<128x128xf32> to vector<128x128xbf16>
    %cst_8 = arith.constant dense<0.000000e+00> : vector<8x128xf32>
    %19 = tpu.matmul %17, %18, %cst_8 {dimension_numbers = #tpu.dot_dimension_numbers<[1], [0], [0], [1], [0, 0, 1, 1], [], []>} : vector<8x128xbf16>, vector<128x128xbf16>, vector<8x128xf32> -> vector<8x128xf32>
    %c17 = arith.constant 17 : index
    %c0_9 = arith.constant 0 : index
    %20 = vector.load %arg2[%c17, %c0_9] : memref<664x128xf32, #tpu.memory_space<vmem>>, vector<1x128xf32>
    %21 = vector.broadcast %20 : vector<1x128xf32> to vector<8x128xf32>
    %22 = arith.addf %19, %21 : vector<8x128xf32>
    %cst_10 = arith.constant 5.000000e-01 : f32
    %23 = vector.broadcast %cst_10 : f32 to vector<8x128xf32>
    %24 = arith.mulf %23, %22 : vector<8x128xf32>
    %cst_11 = arith.constant 0.707106769 : f32
    %25 = vector.broadcast %cst_11 : f32 to vector<8x128xf32>
    %26 = arith.mulf %22, %25 : vector<8x128xf32>
    %27 = math.erf %26 : vector<8x128xf32>
    %cst_12 = arith.constant 1.000000e+00 : f32
    %28 = vector.broadcast %cst_12 : f32 to vector<8x128xf32>
    %29 = arith.addf %28, %27 : vector<8x128xf32>
    %30 = arith.mulf %24, %29 : vector<8x128xf32>
    %c152 = arith.constant 152 : index
    %c0_13 = arith.constant 0 : index
    %31 = vector.load %arg2[%c152, %c0_13] : memref<664x128xf32, #tpu.memory_space<vmem>>, vector<128x128xf32>
    %32 = arith.truncf %30 : vector<8x128xf32> to vector<8x128xbf16>
    %33 = arith.truncf %31 : vector<128x128xf32> to vector<128x128xbf16>
    %cst_14 = arith.constant dense<0.000000e+00> : vector<8x128xf32>
    %34 = tpu.matmul %32, %33, %cst_14 {dimension_numbers = #tpu.dot_dimension_numbers<[1], [0], [0], [1], [0, 0, 1, 1], [], []>} : vector<8x128xbf16>, vector<128x128xbf16>, vector<8x128xf32> -> vector<8x128xf32>
    %c18 = arith.constant 18 : index
    %c0_15 = arith.constant 0 : index
    %35 = vector.load %arg2[%c18, %c0_15] : memref<664x128xf32, #tpu.memory_space<vmem>>, vector<1x128xf32>
    %36 = vector.broadcast %35 : vector<1x128xf32> to vector<8x128xf32>
    %37 = arith.addf %34, %36 : vector<8x128xf32>
    %cst_16 = arith.constant 5.000000e-01 : f32
    %38 = vector.broadcast %cst_16 : f32 to vector<8x128xf32>
    %39 = arith.mulf %38, %37 : vector<8x128xf32>
    %cst_17 = arith.constant 0.707106769 : f32
    %40 = vector.broadcast %cst_17 : f32 to vector<8x128xf32>
    %41 = arith.mulf %37, %40 : vector<8x128xf32>
    %42 = math.erf %41 : vector<8x128xf32>
    %cst_18 = arith.constant 1.000000e+00 : f32
    %43 = vector.broadcast %cst_18 : f32 to vector<8x128xf32>
    %44 = arith.addf %43, %42 : vector<8x128xf32>
    %45 = arith.mulf %39, %44 : vector<8x128xf32>
    %c280 = arith.constant 280 : index
    %c0_19 = arith.constant 0 : index
    %46 = vector.load %arg2[%c280, %c0_19] : memref<664x128xf32, #tpu.memory_space<vmem>>, vector<128x128xf32>
    %47 = arith.truncf %45 : vector<8x128xf32> to vector<8x128xbf16>
    %48 = arith.truncf %46 : vector<128x128xf32> to vector<128x128xbf16>
    %cst_20 = arith.constant dense<0.000000e+00> : vector<8x128xf32>
    %49 = tpu.matmul %47, %48, %cst_20 {dimension_numbers = #tpu.dot_dimension_numbers<[1], [0], [0], [1], [0, 0, 1, 1], [], []>} : vector<8x128xbf16>, vector<128x128xbf16>, vector<8x128xf32> -> vector<8x128xf32>
    %c19 = arith.constant 19 : index
    %c0_21 = arith.constant 0 : index
    %50 = vector.load %arg2[%c19, %c0_21] : memref<664x128xf32, #tpu.memory_space<vmem>>, vector<1x128xf32>
    %51 = vector.broadcast %50 : vector<1x128xf32> to vector<8x128xf32>
    %52 = arith.addf %49, %51 : vector<8x128xf32>
    %cst_22 = arith.constant 5.000000e-01 : f32
    %53 = vector.broadcast %cst_22 : f32 to vector<8x128xf32>
    %54 = arith.mulf %53, %52 : vector<8x128xf32>
    %cst_23 = arith.constant 0.707106769 : f32
    %55 = vector.broadcast %cst_23 : f32 to vector<8x128xf32>
    %56 = arith.mulf %52, %55 : vector<8x128xf32>
    %57 = math.erf %56 : vector<8x128xf32>
    %cst_24 = arith.constant 1.000000e+00 : f32
    %58 = vector.broadcast %cst_24 : f32 to vector<8x128xf32>
    %59 = arith.addf %58, %57 : vector<8x128xf32>
    %60 = arith.mulf %54, %59 : vector<8x128xf32>
    %c408 = arith.constant 408 : index
    %c0_25 = arith.constant 0 : index
    %61 = vector.load %arg2[%c408, %c0_25] : memref<664x128xf32, #tpu.memory_space<vmem>>, vector<128x128xf32>
    %62 = arith.truncf %60 : vector<8x128xf32> to vector<8x128xbf16>
    %63 = arith.truncf %61 : vector<128x128xf32> to vector<128x128xbf16>
    %cst_26 = arith.constant dense<0.000000e+00> : vector<8x128xf32>
    %64 = tpu.matmul %62, %63, %cst_26 {dimension_numbers = #tpu.dot_dimension_numbers<[1], [0], [0], [1], [0, 0, 1, 1], [], []>} : vector<8x128xbf16>, vector<128x128xbf16>, vector<8x128xf32> -> vector<8x128xf32>
    %c20 = arith.constant 20 : index
    %c0_27 = arith.constant 0 : index
    %65 = vector.load %arg2[%c20, %c0_27] : memref<664x128xf32, #tpu.memory_space<vmem>>, vector<1x128xf32>
    %66 = vector.broadcast %65 : vector<1x128xf32> to vector<8x128xf32>
    %67 = arith.addf %64, %66 : vector<8x128xf32>
    %cst_28 = arith.constant 5.000000e-01 : f32
    %68 = vector.broadcast %cst_28 : f32 to vector<8x128xf32>
    %69 = arith.mulf %68, %67 : vector<8x128xf32>
    %cst_29 = arith.constant 0.707106769 : f32
    %70 = vector.broadcast %cst_29 : f32 to vector<8x128xf32>
    %71 = arith.mulf %67, %70 : vector<8x128xf32>
    %72 = math.erf %71 : vector<8x128xf32>
    %cst_30 = arith.constant 1.000000e+00 : f32
    %73 = vector.broadcast %cst_30 : f32 to vector<8x128xf32>
    %74 = arith.addf %73, %72 : vector<8x128xf32>
    %75 = arith.mulf %69, %74 : vector<8x128xf32>
    %76 = tpu.iota {dimensions = array<i32: 1>} : vector<8x128xi32>
    %c32_i32 = arith.constant 32 : i32
    %77 = vector.broadcast %c32_i32 : i32 to vector<8x128xi32>
    %78 = arith.cmpi slt, %76, %77 : vector<8x128xi32>
    %79 = arith.select %78, %60, %75 : vector<8x128xi1>, vector<8x128xf32>
    %c536 = arith.constant 536 : index
    %c0_31 = arith.constant 0 : index
    %80 = vector.load %arg2[%c536, %c0_31] : memref<664x128xf32, #tpu.memory_space<vmem>>, vector<128x128xf32>
    %81 = arith.truncf %79 : vector<8x128xf32> to vector<8x128xbf16>
    %82 = arith.truncf %80 : vector<128x128xf32> to vector<128x128xbf16>
    %cst_32 = arith.constant dense<0.000000e+00> : vector<8x128xf32>
    %83 = tpu.matmul %81, %82, %cst_32 {dimension_numbers = #tpu.dot_dimension_numbers<[1], [0], [0], [1], [0, 0, 1, 1], [], []>} : vector<8x128xbf16>, vector<128x128xbf16>, vector<8x128xf32> -> vector<8x128xf32>
    %c21 = arith.constant 21 : index
    %c0_33 = arith.constant 0 : index
    %84 = vector.load %arg2[%c21, %c0_33] : memref<664x128xf32, #tpu.memory_space<vmem>>, vector<1x128xf32>
    %85 = vector.broadcast %84 : vector<1x128xf32> to vector<8x128xf32>
    %86 = arith.addf %83, %85 : vector<8x128xf32>
    %87 = vector.extract_strided_slice %86 {offsets = [0, 0], sizes = [8, 2], strides = [1, 1]} : vector<8x128xf32> to vector<8x2xf32>
    %88 = tpu.iota {dimensions = array<i32: 1>} : vector<8x2xi32>
    %cst_34 = arith.constant -1.000000e-01 : f32
    %cst_35 = arith.constant 5.000000e+00 : f32
    %89 = vector.broadcast %cst_34 : f32 to vector<8x2xf32>
    %90 = arith.maximumf %89, %87 : vector<8x2xf32>
    %91 = vector.broadcast %cst_35 : f32 to vector<8x2xf32>
    %92 = arith.minimumf %91, %90 : vector<8x2xf32>
    %93 = math.exp %92 : vector<8x2xf32>
    %c1_i32 = arith.constant 1 : i32
    %94 = vector.broadcast %c1_i32 : i32 to vector<8x2xi32>
    %95 = arith.cmpi eq, %88, %94 : vector<8x2xi32>
    %96 = arith.select %95, %93, %87 : vector<8x2xi1>, vector<8x2xf32>
    %c0_36 = arith.constant 0 : index
    %c0_37 = arith.constant 0 : index
    %97 = vector.load %arg3[%c0_36, %c0_37] : memref<8x2xf32, #tpu.memory_space<vmem>>, vector<8x2xf32>
    tpu.vector_store %arg3[%c0_36, %c0_37], %96 {strides = array<i32>} : memref<8x2xf32, #tpu.memory_space<vmem>>, vector<8x2xf32>,
    return
  }
  func.func @transform_0(%arg0: i32) -> (i32, i32) {
    %c0_i32 = arith.constant 0 : i32
    %c0_i32_0 = arith.constant 0 : i32
    return %arg0, %c0_i32 : i32, i32
  }
  func.func @transform_1(%arg0: i32) -> (i32, i32) {
    %c0_i32 = arith.constant 0 : i32
    %c0_i32_0 = arith.constant 0 : i32
    %c0_i32_1 = arith.constant 0 : i32
    return %c0_i32, %c0_i32_0 : i32, i32
  }
  func.func @transform_2(%arg0: i32) -> (i32, i32) {
    %c0_i32 = arith.constant 0 : i32
    %c0_i32_0 = arith.constant 0 : i32
    return %arg0, %c0_i32 : i32, i32
  }
}

module attributes {stable_mosaic.version = 11 : i64} {
  func.func @_critic_kernel(%arg0: i32, %arg1: memref<8x16xf32, #tpu.memory_space<vmem>>, %arg2: memref<664x128xf32, #tpu.memory_space<vmem>>, %arg3: memref<8x2xf32, #tpu.memory_space<vmem>>) attributes {dimension_semantics = [#tpu.dimension_semantics<parallel>], iteration_bounds = array<i64: 1>, scalar_prefetch = 0 : i64, scratch_operands = 0 : i64, tpu.core_type = #tpu.core_type<tc>, window_params = [{transform_indices = @transform_0, window_bounds = array<i64: 8, 16>}, {pipeline_mode = #tpu.pipeline_mode<synchronous>, transform_indices = @transform_1, window_bounds = array<i64: 664, 128>}, {transform_indices = @transform_2, window_bounds = array<i64: 8, 2>}]} {
    %c0 = arith.constant 0 : index
    %c0_0 = arith.constant 0 : index
    %0 = vector.load %arg1[%c0, %c0_0] : memref<8x16xf32, #tpu.memory_space<vmem>>, vector<8x16xf32>
    %c0_1 = arith.constant 0 : index
    %c0_2 = arith.constant 0 : index
    %1 = vector.load %arg2[%c0_1, %c0_2] : memref<664x128xf32, #tpu.memory_space<vmem>>, vector<16x128xf32>
    %2 = arith.truncf %0 : vector<8x16xf32> to vector<8x16xbf16>
    %3 = arith.truncf %1 : vector<16x128xf32> to vector<16x128xbf16>
    %cst = arith.constant dense<0.000000e+00> : vector<8x128xf32>
    %4 = tpu.matmul %2, %3, %cst {dimension_numbers = #tpu.dot_dimension_numbers<[1], [0], [0], [1], [0, 0, 1, 1], [], []>} : vector<8x16xbf16>, vector<16x128xbf16>, vector<8x128xf32> -> vector<8x128xf32>
    %c16 = arith.constant 16 : index
    %c0_3 = arith.constant 0 : index
    %5 = vector.load %arg2[%c16, %c0_3] : memref<664x128xf32, #tpu.memory_space<vmem>>, vector<1x128xf32>
    %6 = vector.broadcast %5 : vector<1x128xf32> to vector<8x128xf32>
    %7 = arith.addf %4, %6 : vector<8x128xf32>
    %cst_4 = arith.constant 5.000000e-01 : f32
    %8 = vector.broadcast %cst_4 : f32 to vector<8x128xf32>
    %9 = arith.mulf %8, %7 : vector<8x128xf32>
    %cst_5 = arith.constant 0.707106769 : f32
    %10 = vector.broadcast %cst_5 : f32 to vector<8x128xf32>
    %11 = arith.mulf %7, %10 : vector<8x128xf32>
    %12 = math.erf %11 : vector<8x128xf32>
    %cst_6 = arith.constant 1.000000e+00 : f32
    %13 = vector.broadcast %cst_6 : f32 to vector<8x128xf32>
    %14 = arith.addf %13, %12 : vector<8x128xf32>
    %15 = arith.mulf %9, %14 : vector<8x128xf32>
    %c24 = arith.constant 24 : index
    %c0_7 = arith.constant 0 : index
    %16 = vector.load %arg2[%c24, %c0_7] : memref<664x128xf32, #tpu.memory_space<vmem>>, vector<128x128xf32>
    %17 = arith.truncf %15 : vector<8x128xf32> to vector<8x128xbf16>
    %18 = arith.truncf %16 : vector<128x128xf32> to vector<128x128xbf16>
    %cst_8 = arith.constant dense<0.000000e+00> : vector<8x128xf32>
    %19 = tpu.matmul %17, %18, %cst_8 {dimension_numbers = #tpu.dot_dimension_numbers<[1], [0], [0], [1], [0, 0, 1, 1], [], []>} : vector<8x128xbf16>, vector<128x128xbf16>, vector<8x128xf32> -> vector<8x128xf32>
    %c17 = arith.constant 17 : index
    %c0_9 = arith.constant 0 : index
    %20 = vector.load %arg2[%c17, %c0_9] : memref<664x128xf32, #tpu.memory_space<vmem>>, vector<1x128xf32>
    %21 = vector.broadcast %20 : vector<1x128xf32> to vector<8x128xf32>
    %22 = arith.addf %19, %21 : vector<8x128xf32>
    %cst_10 = arith.constant 5.000000e-01 : f32
    %23 = vector.broadcast %cst_10 : f32 to vector<8x128xf32>
    %24 = arith.mulf %23, %22 : vector<8x128xf32>
    %cst_11 = arith.constant 0.707106769 : f32
    %25 = vector.broadcast %cst_11 : f32 to vector<8x128xf32>
    %26 = arith.mulf %22, %25 : vector<8x128xf32>
    %27 = math.erf %26 : vector<8x128xf32>
    %cst_12 = arith.constant 1.000000e+00 : f32
    %28 = vector.broadcast %cst_12 : f32 to vector<8x128xf32>
    %29 = arith.addf %28, %27 : vector<8x128xf32>
    %30 = arith.mulf %24, %29 : vector<8x128xf32>
    %c152 = arith.constant 152 : index
    %c0_13 = arith.constant 0 : index
    %31 = vector.load %arg2[%c152, %c0_13] : memref<664x128xf32, #tpu.memory_space<vmem>>, vector<128x128xf32>
    %32 = arith.truncf %30 : vector<8x128xf32> to vector<8x128xbf16>
    %33 = arith.truncf %31 : vector<128x128xf32> to vector<128x128xbf16>
    %cst_14 = arith.constant dense<0.000000e+00> : vector<8x128xf32>
    %34 = tpu.matmul %32, %33, %cst_14 {dimension_numbers = #tpu.dot_dimension_numbers<[1], [0], [0], [1], [0, 0, 1, 1], [], []>} : vector<8x128xbf16>, vector<128x128xbf16>, vector<8x128xf32> -> vector<8x128xf32>
    %c18 = arith.constant 18 : index
    %c0_15 = arith.constant 0 : index
    %35 = vector.load %arg2[%c18, %c0_15] : memref<664x128xf32, #tpu.memory_space<vmem>>, vector<1x128xf32>
    %36 = vector.broadcast %35 : vector<1x128xf32> to vector<8x128xf32>
    %37 = arith.addf %34, %36 : vector<8x128xf32>
    %cst_16 = arith.constant 5.000000e-01 : f32
    %38 = vector.broadcast %cst_16 : f32 to vector<8x128xf32>
    %39 = arith.mulf %38, %37 : vector<8x128xf32>
    %cst_17 = arith.constant 0.707106769 : f32
    %40 = vector.broadcast %cst_17 : f32 to vector<8x128xf32>
    %41 = arith.mulf %37, %40 : vector<8x128xf32>
    %42 = math.erf %41 : vector<8x128xf32>
    %cst_18 = arith.constant 1.000000e+00 : f32
    %43 = vector.broadcast %cst_18 : f32 to vector<8x128xf32>
    %44 = arith.addf %43, %42 : vector<8x128xf32>
    %45 = arith.mulf %39, %44 : vector<8x128xf32>
    %c280 = arith.constant 280 : index
    %c0_19 = arith.constant 0 : index
    %46 = vector.load %arg2[%c280, %c0_19] : memref<664x128xf32, #tpu.memory_space<vmem>>, vector<128x128xf32>
    %47 = arith.truncf %45 : vector<8x128xf32> to vector<8x128xbf16>
    %48 = arith.truncf %46 : vector<128x128xf32> to vector<128x128xbf16>
    %cst_20 = arith.constant dense<0.000000e+00> : vector<8x128xf32>
    %49 = tpu.matmul %47, %48, %cst_20 {dimension_numbers = #tpu.dot_dimension_numbers<[1], [0], [0], [1], [0, 0, 1, 1], [], []>} : vector<8x128xbf16>, vector<128x128xbf16>, vector<8x128xf32> -> vector<8x128xf32>
    %c19 = arith.constant 19 : index
    %c0_21 = arith.constant 0 : index
    %50 = vector.load %arg2[%c19, %c0_21] : memref<664x128xf32, #tpu.memory_space<vmem>>, vector<1x128xf32>
    %51 = vector.broadcast %50 : vector<1x128xf32> to vector<8x128xf32>
    %52 = arith.addf %49, %51 : vector<8x128xf32>
    %cst_22 = arith.constant 5.000000e-01 : f32
    %53 = vector.broadcast %cst_22 : f32 to vector<8x128xf32>
    %54 = arith.mulf %53, %52 : vector<8x128xf32>
    %cst_23 = arith.constant 0.707106769 : f32
    %55 = vector.broadcast %cst_23 : f32 to vector<8x128xf32>
    %56 = arith.mulf %52, %55 : vector<8x128xf32>
    %57 = math.erf %56 : vector<8x128xf32>
    %cst_24 = arith.constant 1.000000e+00 : f32
    %58 = vector.broadcast %cst_24 : f32 to vector<8x128xf32>
    %59 = arith.addf %58, %57 : vector<8x128xf32>
    %60 = arith.mulf %54, %59 : vector<8x128xf32>
    %c408 = arith.constant 408 : index
    %c0_25 = arith.constant 0 : index
    %61 = vector.load %arg2[%c408, %c0_25] : memref<664x128xf32, #tpu.memory_space<vmem>>, vector<128x128xf32>
    %62 = arith.truncf %60 : vector<8x128xf32> to vector<8x128xbf16>
    %63 = arith.truncf %61 : vector<128x128xf32> to vector<128x128xbf16>
    %cst_26 = arith.constant dense<0.000000e+00> : vector<8x128xf32>
    %64 = tpu.matmul %62, %63, %cst_26 {dimension_numbers = #tpu.dot_dimension_numbers<[1], [0], [0], [1], [0, 0, 1, 1], [], []>} : vector<8x128xbf16>, vector<128x128xbf16>, vector<8x128xf32> -> vector<8x128xf32>
    %c20 = arith.constant 20 : index
    %c0_27 = arith.constant 0 : index
    %65 = vector.load %arg2[%c20, %c0_27] : memref<664x128xf32, #tpu.memory_space<vmem>>, vector<1x128xf32>
    %66 = vector.broadcast %65 : vector<1x128xf32> to vector<8x128xf32>
    %67 = arith.addf %64, %66 : vector<8x128xf32>
    %cst_28 = arith.constant 5.000000e-01 : f32
    %68 = vector.broadcast %cst_28 : f32 to vector<8x128xf32>
    %69 = arith.mulf %68, %67 : vector<8x128xf32>
    %cst_29 = arith.constant 0.707106769 : f32
    %70 = vector.broadcast %cst_29 : f32 to vector<8x128xf32>
    %71 = arith.mulf %67, %70 : vector<8x128xf32>
    %72 = math.erf %71 : vector<8x128xf32>
    %cst_30 = arith.constant 1.000000e+00 : f32
    %73 = vector.broadcast %cst_30 : f32 to vector<8x128xf32>
    %74 = arith.addf %73, %72 : vector<8x128xf32>
    %75 = arith.mulf %69, %74 : vector<8x128xf32>
    %76 = tpu.iota {dimensions = array<i32: 1>} : vector<8x128xi32>
    %c32_i32 = arith.constant 32 : i32
    %77 = vector.broadcast %c32_i32 : i32 to vector<8x128xi32>
    %78 = arith.cmpi slt, %76, %77 : vector<8x128xi32>
    %79 = arith.select %78, %60, %75 : vector<8x128xi1>, vector<8x128xf32>
    %c536 = arith.constant 536 : index
    %c0_31 = arith.constant 0 : index
    %80 = vector.load %arg2[%c536, %c0_31] : memref<664x128xf32, #tpu.memory_space<vmem>>, vector<128x128xf32>
    %81 = arith.truncf %79 : vector<8x128xf32> to vector<8x128xbf16>
    %82 = arith.truncf %80 : vector<128x128xf32> to vector<128x128xbf16>
    %cst_32 = arith.constant dense<0.000000e+00> : vector<8x128xf32>
    %83 = tpu.matmul %81, %82, %cst_32 {dimension_numbers = #tpu.dot_dimension_numbers<[1], [0], [0], [1], [0, 0, 1, 1], [], []>} : vector<8x128xbf16>, vector<128x128xbf16>, vector<8x128xf32> -> vector<8x128xf32>
    %c21 = arith.constant 21 : index
    %c0_33 = arith.constant 0 : index
    %84 = vector.load %arg2[%c21, %c0_33] : memref<664x128xf32, #tpu.memory_space<vmem>>, vector<1x128xf32>
    %85 = vector.broadcast %84 : vector<1x128xf32> to vector<8x128xf32>
    %86 = arith.addf %83, %85 : vector<8x128xf32>
    %87 = vector.extract_strided_slice %86 {offsets = [0, 0], sizes = [8, 2], strides = [1, 1]} : vector<8x128xf32> to vector<8x2xf32>
    %88 = tpu.iota {dimensions = array<i32: 1>} : vector<8x2xi32>
    %cst_34 = arith.constant -1.000000e-01 : f32
    %cst_35 = arith.constant 5.000000e+00 : f32
    %89 = vector.broadcast %cst_34 : f32 to vector<8x2xf32>
    %90 = arith.maximumf %89, %87 : vector<8x2xf32>
    %91 = vector.broadcast %cst_35 : f32 to vector<8x2xf32>
    %92 = arith.minimumf %91, %90 : vector<8x2xf32>
    %93 = math.exp %92 : vector<8x2xf32>
    %c1_i32 = arith.constant 1 : i32
    %94 = vector.broadcast %c1_i32 : i32 to vector<8x2xi32>
    %95 = arith.cmpi eq, %88, %94 : vector<8x2xi32>
    %96 = arith.select %95, %93, %87 : vector<8x2xi1>, vector<8x2xf32>
    %c0_36 = arith.constant 0 : index
    %c0_37 = arith.constant 0 : index
    %97 = vector.load %arg3[%c0_36, %c0_37] : memref<8x2xf32, #tpu.memory_space<vmem>>, vector<8x2xf32>
    tpu.vector_store %arg3[%c0_36, %c0_37], %96 {strides = array<i32>} : memref<8x2xf32, #tpu.memory_space<vmem>>, vector<8x2xf32>,
    return
  }
  func.func @transform_0(%arg0: i32) -> (i32, i32) {
    %c0_i32 = arith.constant 0 : i32
    %c0_i32_0 = arith.constant 0 : i32
    return %arg0, %c0_i32 : i32, i32
  }
  func.func @transform_1(%arg0: i32) -> (i32, i32) {
    %c0_i32 = arith.constant 0 : i32
    %c0_i32_0 = arith.constant 0 : i32
    %c0_i32_1 = arith.constant 0 : i32
    return %c0_i32, %c0_i32_0 : i32, i32
  }
  func.func @transform_2(%arg0: i32) -> (i32, i32) {
    %c0_i32 = arith.constant 0 : i32
    %c0_i32_0 = arith.constant 0 : i32
    return %arg0, %c0_i32 : i32, i32
  }
}

</mosaic_0001>

<bundles_post_ra>
// kernel: tpu_custom_call.1
= control target key start
LH: loop header
LB: loop body
LE: loop exit
PB: predicated region body
PF: predicated region fallthrough
CT: control target
= control target key end

     0   :  { %7 = vsyncpa [#allocation3], 0  ;;  %s819_s0 = inlined_call_operand.hbm [shape: f32[8,16], index: 0, kind: input, shape index: {}]   ;;  %s820_s1 = inlined_call_operand.hbm [shape: f32[664,128], index: 1, kind: input, shape index: {}]   ;;  %s821_s2 = inlined_call_operand.vmem [shape: f32[8,2], index: 2, kind: output, shape index: {}]  }
   0x1   :  { %8 = vsyncpa [#allocation5], 0  ;;  %s711_s9 = smov [#allocation2]   ;;  %s712_s11 = smov [#allocation4]  }
   0x2   :  { %s15_s10 = sshll.u32 %s711_s9, 4  ;;  %s24_s12 = sshll.u32 %s712_s11, 4  ;;  %s16_s10 = int_to_ptr.vmem [resolvable:$true] %s15_s10  ;;  %s732_s12 = int_to_ptr.vmem [resolvable:$true] %s24_s12 }
   0x3   :  { %s663_s15 = scalar_lea.hbm %s819_s0, 128 }
   0x4   :  { %p664_p0 = scmp.ne.s32.totalorder %s819_s0, %s663_s15  ;;  %p667_p1 = scmp.lt.u32.totalorder %s663_s15, %s819_s0 }
   0x6   :  { %p669_p2 = pnand %p667_p1, %p664_p0 }
   0x8   :  { %672 = shalt.err (!%p669_p2)
}
   0x9   :  { %s673_s20 = scalar_lea.vmem %s16_s10, 128  ;;  %p678_p4 = scmp.lt.s32.totalorder %s16_s10, %s16_s10 }
   0xa   :  { %p674_p3 = scmp.ne.s32.totalorder %s16_s10, %s673_s20  ;;  %p679_p5 = scmp.lt.s32.totalorder %s673_s20, %s673_s20 }
   0xc   :  { %p680_p6 = por %p679_p5, %p678_p4 }
   0xe   :  { %p681_p7 = pnand %p680_p6, %p674_p3 }
  0x10   :  { %684 = shalt.err (!%p681_p7)
}
  0x11   :  { %18 = dma.hbm_to_vmem [thread:$0]  %s819_s0, 128, %s16_s10, [#allocation3]  }
  0x12   :  { %s685_s25 = scalar_lea.hbm %s820_s1, 10624 }
  0x13   :  { %p686_p8 = scmp.ne.s32.totalorder %s820_s1, %s685_s25  ;;  %p689_p9 = scmp.lt.u32.totalorder %s685_s25, %s820_s1 }
  0x15   :  { %p691_p10 = pnand %p689_p9, %p686_p8 }
  0x17   :  { %694 = shalt.err (!%p691_p10)
}
  0x18   :  { %s695_s30 = scalar_lea.vmem %s732_s12, 10624  ;;  %p700_p12 = scmp.lt.s32.totalorder %s732_s12, %s732_s12 }
  0x19   :  { %p696_p11 = scmp.ne.s32.totalorder %s732_s12, %s695_s30  ;;  %p701_p13 = scmp.lt.s32.totalorder %s695_s30, %s695_s30 }
  0x1b   :  { %p702_p0 = por %p701_p13, %p700_p12 }
  0x1d   :  { %p703_p1 = pnand %p702_p0, %p696_p11 }
  0x1f   :  { %706 = shalt.err (!%p703_p1)
}
  0x20   :  { %s713_s0 = smov 128   ;;  %s714_s3 = smov 8  }
  0x21   :  { %30 = dma.hbm_to_vmem [thread:$0]  %s820_s1, 10624, %s732_s12, [#allocation5], %s713_s0, %s713_s0, %s714_s3  }
  0x22   :  { %707 = dma.done.wait [#allocation3], 128  }
  0x23   :  { %708 = vsyncadd [#allocation3], 4294967168 }
  0x24   :  { %709 = dma.done.wait [#allocation5], 10624  }
  0x25   :  { %710 = vsyncadd [#allocation5], 4294956672  ;;  %v715_v0 = vmov 0.0   ;;  %vm716_vm0 = vmmov 0   ;;  %v39_v1 = vld [vmem:[#allocation4] sm:$0xff]  ;;  %v40_v2 = vld [vmem:[#allocation4 + $0x8] sm:$0xff] }
  0x26   :  { %539 = vmatprep.subr.bf16.mxu0 %v715_v0  ;;  %541 = vmatprep.mubr.msk.bf16.mxu0 %vm716_vm0, %v715_v0  ;;  %v38_v3 = vld [vmem:[#allocation2] sm:$0xff]  ;;  %v42_v4 = vpack.c.bf16 %v40_v2, %v39_v1  ;;  %v98_v6 = vld [vmem:[#allocation4 + $0x20] sm:$0xff]  ;;  %v99_v7 = vld [vmem:[#allocation4 + $0x28] sm:$0xff]  ;;  %vm48_vm1 = vcmask 130048   ;;  %vm477_vm4 = vcmask 15360  }
  0x27   :  { %545 = vmatprep.subr.bf16.mxu1 %v715_v0  ;;  %561 = vmatprep.mubr.msk.bf16.mxu1 %vm716_vm0, %v715_v0  ;;  %v97_v5 = vld [vmem:[#allocation4 + $0x18] sm:$0xff]  ;;  %v41_v8 = vpack.c.bf16 %v38_v3, %v38_v3  ;;  %v100_v10 = vld [vmem:[#allocation4 + $0x30] sm:$0xff]  ;;  %v102_v13 = vld [vmem:[#allocation4 + $0x40] sm:$0xff] }
  0x28   :  { %v114_v9 = vpack.c.bf16 %v98_v6, %v97_v5  ;;  %540 = vmatpush3.bf16.msra.mxu0 %v42_v4  ;;  %v115_v11 = vpack.c.bf16 %v100_v10, %v99_v7  ;;  %v101_v12 = vld [vmem:[#allocation4 + $0x38] sm:$0xff]  ;;  %v103_v15 = vld [vmem:[#allocation4 + $0x48] sm:$0xff]  ;;  %v104_v16 = vld [vmem:[#allocation4 + $0x50] sm:$0xff] }
  0x29   :  { %565 = vmatprep.subr.bf16.mxu0 %v715_v0  ;;  %v116_v14 = vpack.c.bf16 %v102_v13, %v101_v12  ;;  %v117_v17 = vpack.c.bf16 %v104_v16, %v103_v15  ;;  %v105_v18 = vld [vmem:[#allocation4 + $0x58] sm:$0xff]  ;;  %v106_v19 = vld [vmem:[#allocation4 + $0x60] sm:$0xff]  ;;  %v107_v21 = vld [vmem:[#allocation4 + $0x68] sm:$0xff] }
  0x2a   :  { %546 = vmatpush3.bf16.msra.mxu1 %v114_v9  ;;  %v118_v20 = vpack.c.bf16 %v106_v19, %v105_v18  ;;  %v108_v22 = vld [vmem:[#allocation4 + $0x70] sm:$0xff]  ;;  %v109_v24 = vld [vmem:[#allocation4 + $0x78] sm:$0xff]  ;;  %v110_v25 = vld [vmem:[#allocation4 + $0x80] sm:$0xff] }
  0x2b   :  { %547 = vmatprep.subr.bf16.mxu1 %v715_v0  ;;  %542 = vmatmul.mubr.msk.bf16.vlgmr.msra.gmra.mrb[0].mxu0 %vm48_vm1, %v41_v8  ;;  %v119_v23 = vpack.c.bf16 %v108_v22, %v107_v21  ;;  %v120_v26 = vpack.c.bf16 %v110_v25, %v109_v24  ;;  %v111_v27 = vld [vmem:[#allocation4 + $0x88] sm:$0xff]  ;;  %v112_v28 = vld [vmem:[#allocation4 + $0x90] sm:$0xff]  ;;  %v172_v30 = vld [vmem:[#allocation4 + $0x98] sm:$0xff] }
  0x2c   :  { %581 = vmatprep.mubr.msk.bf16.mxu0 %vm716_vm0, %v715_v0  ;;  %v121_v29 = vpack.c.bf16 %v112_v28, %v111_v27  ;;  %v173_v31 = vld [vmem:[#allocation4 + $0xa0] sm:$0xff]  ;;  %v174_v32 = vld [vmem:[#allocation4 + $0xa8] sm:$0xff]  ;;  %v175_v34 = vld [vmem:[#allocation4 + $0xb0] sm:$0xff] }
  0x2d   :  { %v189_v33 = vpack.c.bf16 %v173_v31, %v172_v30  ;;  %v190_v35 = vpack.c.bf16 %v175_v34, %v174_v32  ;;  %v176_v36 = vld [vmem:[#allocation4 + $0xb8] sm:$0xff]  ;;  %v177_v37 = vld [vmem:[#allocation4 + $0xc0] sm:$0xff]  ;;  %v485_v39 = vld [vmem:[#allocation4 + $0x10] ss:$0 sm:$0xff] }
  0x2e   :  { %548 = vmatpush3.bf16.msra.mxu1 %v115_v11  ;;  %v191_v38 = vpack.c.bf16 %v177_v37, %v176_v36  ;;  %v178_v51 = vld [vmem:[#allocation4 + $0xc8] sm:$0xff]  ;;  %v179_v52 = vld [vmem:[#allocation4 + $0xd0] sm:$0xff]  ;;  %v180_v54 = vld [vmem:[#allocation4 + $0xd8] sm:$0xff] }
  0x2f   :  { %549 = vmatprep.subr.bf16.mxu1 %v715_v0  ;;  %566 = vmatpush3.bf16.msra.mxu0 %v189_v33  ;;  %v192_v53 = vpack.c.bf16 %v179_v52, %v178_v51  ;;  %v181_v55 = vld [vmem:[#allocation4 + $0xe0] sm:$0xff]  ;;  %v182_v57 = vld [vmem:[#allocation4 + $0xe8] sm:$0xff]  ;;  %v183_v58 = vld [vmem:[#allocation4 + $0xf0] sm:$0xff] }
  0x30   :  { %567 = vmatprep.subr.bf16.mxu0 %v715_v0  ;;  %v193_v56 = vpack.c.bf16 %v181_v55, %v180_v54  ;;  %v194_v59 = vpack.c.bf16 %v183_v58, %v182_v57  ;;  %v184_v60 = vld [vmem:[#allocation4 + $0xf8] sm:$0xff]  ;;  %v185_v61 = vld [vmem:[#allocation4 + $0x100] sm:$0xff]  ;;  %v186_v63 = vld [vmem:[#allocation4 + $0x108] sm:$0xff] }
  0x31   :  { %v195_v62 = vpack.c.bf16 %v185_v61, %v184_v60  ;;  %v187_v1 = vld [vmem:[#allocation4 + $0x110] sm:$0xff]  ;;  %v247_v3 = vld [vmem:[#allocation4 + $0x118] sm:$0xff]  ;;  %v248_v4 = vld [vmem:[#allocation4 + $0x120] sm:$0xff] }
  0x32   :  { %550 = vmatpush3.bf16.msra.mxu1 %v116_v14  ;;  %v196_v2 = vpack.c.bf16 %v187_v1, %v186_v63  ;;  %v249_v5 = vld [vmem:[#allocation4 + $0x128] sm:$0xff]  ;;  %v264_v6 = vpack.c.bf16 %v248_v4, %v247_v3  ;;  %v250_v7 = vld [vmem:[#allocation4 + $0x130] sm:$0xff]  ;;  %v251_v9 = vld [vmem:[#allocation4 + $0x138] sm:$0xff] }
  0x33   :  { %551 = vmatprep.subr.bf16.mxu1 %v715_v0  ;;  %568 = vmatpush3.bf16.msra.mxu0 %v190_v35  ;;  %v265_v8 = vpack.c.bf16 %v250_v7, %v249_v5  ;;  %v252_v10 = vld [vmem:[#allocation4 + $0x140] sm:$0xff]  ;;  %v487_v12 = vld [vmem:[#allocation4 + $0x11] ss:$0 sm:$0xff]  ;;  %v253_v24 = vld [vmem:[#allocation4 + $0x148] sm:$0xff] }
  0x34   :  { %569 = vmatprep.subr.bf16.mxu0 %v715_v0  ;;  %v266_v11 = vpack.c.bf16 %v252_v10, %v251_v9  ;;  %v254_v25 = vld [vmem:[#allocation4 + $0x150] sm:$0xff]  ;;  %v255_v27 = vld [vmem:[#allocation4 + $0x158] sm:$0xff]  ;;  %v256_v28 = vld [vmem:[#allocation4 + $0x160] sm:$0xff] }
  0x35   :  { %v257_v30 = vld [vmem:[#allocation4 + $0x168] sm:$0xff]  ;;  %v258_v31 = vld [vmem:[#allocation4 + $0x170] sm:$0xff]  ;;  %v259_v33 = vld [vmem:[#allocation4 + $0x178] sm:$0xff] }
  0x36   :  { %552 = vmatpush3.bf16.msra.mxu1 %v117_v17  ;;  %v269_v32 = vpack.c.bf16 %v258_v31, %v257_v30  ;;  %v260_v34 = vld [vmem:[#allocation4 + $0x180] sm:$0xff]  ;;  %v261_v36 = vld [vmem:[#allocation4 + $0x188] sm:$0xff]  ;;  %v262_v37 = vld [vmem:[#allocation4 + $0x190] sm:$0xff] }
  0x37   :  { %553 = vmatprep.subr.bf16.mxu1 %v715_v0  ;;  %570 = vmatpush3.bf16.msra.mxu0 %v191_v38  ;;  %v270_v35 = vpack.c.bf16 %v260_v34, %v259_v33  ;;  %v271_v38 = vpack.c.bf16 %v262_v37, %v261_v36  ;;  %v328_v60 = vld [vmem:[#allocation4 + $0x1c8] sm:$0xff]  ;;  %v329_v61 = vld [vmem:[#allocation4 + $0x1d0] sm:$0xff]  ;;  %v330_v63 = vld [vmem:[#allocation4 + $0x1d8] sm:$0xff] }
  0x38   :  { %571 = vmatprep.subr.bf16.mxu0 %v715_v0  ;;  %v331_v1 = vld [vmem:[#allocation4 + $0x1e0] sm:$0xff]  ;;  %v332_v3 = vld [vmem:[#allocation4 + $0x1e8] sm:$0xff]  ;;  %v333_v4 = vld [vmem:[#allocation4 + $0x1f0] sm:$0xff] }
  0x39   :  { %v344_v5 = vpack.c.bf16 %v333_v4, %v332_v3  ;;  %v335_v7 = vld [vmem:[#allocation4 + $0x200] sm:$0xff]  ;;  %v336_v9 = vld [vmem:[#allocation4 + $0x208] sm:$0xff]  ;;  %v337_v10 = vld [vmem:[#allocation4 + $0x210] sm:$0xff] }
  0x3a   :  { %554 = vmatpush3.bf16.msra.mxu1 %v118_v20  ;;  %v405_v30 = vld [vmem:[#allocation4 + $0x238] sm:$0xff]  ;;  %v406_v31 = vld [vmem:[#allocation4 + $0x240] sm:$0xff]  ;;  %v407_v33 = vld [vmem:[#allocation4 + $0x248] sm:$0xff] }
  0x3b   :  { %555 = vmatprep.subr.bf16.mxu1 %v715_v0  ;;  %572 = vmatpush3.bf16.msra.mxu0 %v192_v53  ;;  %v408_v34 = vld [vmem:[#allocation4 + $0x250] sm:$0xff]  ;;  %v409_v36 = vld [vmem:[#allocation4 + $0x258] sm:$0xff]  ;;  %v410_v37 = vld [vmem:[#allocation4 + $0x260] sm:$0xff] }
  0x3c   :  { %573 = vmatprep.subr.bf16.mxu0 %v715_v0 }
  0x3e   :  { %556 = vmatpush3.bf16.msra.mxu1 %v119_v23 }
  0x3f   :  { %557 = vmatprep.subr.bf16.mxu1 %v715_v0  ;;  %574 = vmatpush3.bf16.msra.mxu0 %v193_v56 }
  0x40   :  { %575 = vmatprep.subr.bf16.mxu0 %v715_v0 }
  0x42   :  { %558 = vmatpush3.bf16.msra.mxu1 %v120_v26  ;;  %v267_v26 = vpack.c.bf16 %v254_v25, %v253_v24 }
  0x43   :  { %559 = vmatprep.subr.bf16.mxu1 %v715_v0  ;;  %576 = vmatpush3.bf16.msra.mxu0 %v194_v59 }
  0x44   :  { %577 = vmatprep.subr.bf16.mxu0 %v715_v0 }
  0x46   :  { %560 = vmatpush3.bf16.msra.mxu1 %v121_v29  ;;  %v268_v29 = vpack.c.bf16 %v256_v28, %v255_v27 }
  0x47   :  { %585 = vmatprep.subr.bf16.mxu1 %v715_v0  ;;  %578 = vmatpush3.bf16.msra.mxu0 %v195_v62  ;;  %v342_v62 = vpack.c.bf16 %v329_v61, %v328_v60 }
  0x48   :  { %579 = vmatprep.subr.bf16.mxu0 %v715_v0 }
  0x4b   :  { %580 = vmatpush3.bf16.msra.mxu0 %v196_v2  ;;  %v343_v2 = vpack.c.bf16 %v331_v1, %v330_v63 }
  0x4c   :  { %605 = vmatprep.subr.bf16.mxu0 %v715_v0 }
  0xfe   :  { %v86_v40 = vpop.f32.mrb[0].mxu0 }
  0xff   :  { %v87_v41 = vadd.f32 %v485_v39, %v86_v40  ;;  %v543_v42 = vpop.f32.mrb[1].mxu0  ;;  %v322_v39 = vld [vmem:[#allocation4 + $0x198] sm:$0xff]  ;;  %v323_v40 = vld [vmem:[#allocation4 + $0x1a0] sm:$0xff] }
 0x100   :  { %v89_v43 = vpop.f32.mrb[2].mxu0  ;;  %v339_v42 = vpack.c.bf16 %v323_v40, %v322_v39  ;;  %v411_v39 = vld [vmem:[#allocation4 + $0x268] sm:$0xff]  ;;  %v412_v40 = vld [vmem:[#allocation4 + $0x270] sm:$0xff] }
 0x101   :  { %v93_v44 = vmul.f32 0.70710677, %v87_v41  ;;  %v544_v45 = vpop.f32.mrb[3].mxu0  ;;  %v92_v47 = vmul.f32 0.5, %v87_v41  ;;  %v324_v41 = vld [vmem:[#allocation4 + $0x1a8] sm:$0xff]  ;;  %v325_v43 = vld [vmem:[#allocation4 + $0x1b0] sm:$0xff] }
 0x102   :  { %v326_v45 = vld [vmem:[#allocation4 + $0x1b8] sm:$0xff] }
 0x103   :  { %651 = verf.f32 %v93_v44  ;;  %v340_v44 = vpack.c.bf16 %v325_v43, %v324_v41  ;;  %v423_v41 = vpack.c.bf16 %v412_v40, %v411_v39  ;;  %v414_v43 = vld [vmem:[#allocation4 + $0x280] sm:$0xff] }
 0x10d   :  { %v652_v46 = vpop.eup %651 }
 0x10e   :  { %v95_v48 = vadd.f32 1.0, %v652_v46  ;;  %v327_v46 = vld [vmem:[#allocation4 + $0x1c0] sm:$0xff] }
 0x110   :  { %v96_v49 = vmul.f32 %v95_v48, %v92_v47  ;;  %v341_v47 = vpack.c.bf16 %v327_v46, %v326_v45  ;;  %v488_v48 = vld [vmem:[#allocation4 + $0x12] ss:$0 sm:$0xff]  ;;  %v415_v45 = vld [vmem:[#allocation4 + $0x288] sm:$0xff] }
 0x111   :  { %v416_v46 = vld [vmem:[#allocation4 + $0x290] sm:$0xff] }
 0x112   :  { %v113_v50 = vpack.c.bf16 %v96_v49, %v96_v49 }
 0x114   :  { %562 = vmatmul.mubr.bf16.vlgmr.msra.gmra.mrb[0].mxu1 %v113_v50 }
 0x115   :  { %601 = vmatprep.mubr.msk.bf16.mxu1 %vm716_vm0, %v715_v0  ;;  %586 = vmatpush3.bf16.msra.mxu1 %v264_v6  ;;  %v334_v6 = vld [vmem:[#allocation4 + $0x1f8] sm:$0xff] }
 0x116   :  { %587 = vmatprep.subr.bf16.mxu1 %v715_v0 }
 0x119   :  { %588 = vmatpush3.bf16.msra.mxu1 %v265_v8  ;;  %v345_v8 = vpack.c.bf16 %v335_v7, %v334_v6 }
 0x11a   :  { %589 = vmatprep.subr.bf16.mxu1 %v715_v0 }
 0x11d   :  { %590 = vmatpush3.bf16.msra.mxu1 %v266_v11  ;;  %v346_v11 = vpack.c.bf16 %v337_v10, %v336_v9 }
 0x11e   :  { %591 = vmatprep.subr.bf16.mxu1 %v715_v0 }
 0x121   :  { %592 = vmatpush3.bf16.msra.mxu1 %v267_v26 }
 0x122   :  { %593 = vmatprep.subr.bf16.mxu1 %v715_v0 }
 0x125   :  { %594 = vmatpush3.bf16.msra.mxu1 %v268_v29 }
 0x126   :  { %595 = vmatprep.subr.bf16.mxu1 %v715_v0 }
 0x129   :  { %596 = vmatpush3.bf16.msra.mxu1 %v269_v32  ;;  %v420_v32 = vpack.c.bf16 %v406_v31, %v405_v30 }
 0x12a   :  { %597 = vmatprep.subr.bf16.mxu1 %v715_v0 }
 0x12d   :  { %598 = vmatpush3.bf16.msra.mxu1 %v270_v35  ;;  %v421_v35 = vpack.c.bf16 %v408_v34, %v407_v33 }
 0x12e   :  { %599 = vmatprep.subr.bf16.mxu1 %v715_v0 }
 0x131   :  { %600 = vmatpush3.bf16.msra.mxu1 %v271_v38  ;;  %v422_v38 = vpack.c.bf16 %v410_v37, %v409_v36 }
 0x132   :  { %625 = vmatprep.subr.bf16.mxu1 %v715_v0 }
 0x1e7   :  { %v161_v13 = vpop.f32.mrb[0].mxu1 }
 0x1e8   :  { %v162_v14 = vadd.f32 %v487_v12, %v161_v13  ;;  %v563_v15 = vpop.f32.mrb[1].mxu1  ;;  %v401_v12 = vld [vmem:[#allocation4 + $0x218] sm:$0xff]  ;;  %v402_v13 = vld [vmem:[#allocation4 + $0x220] sm:$0xff] }
 0x1e9   :  { %v164_v16 = vpop.f32.mrb[2].mxu1  ;;  %v418_v15 = vpack.c.bf16 %v402_v13, %v401_v12 }
 0x1ea   :  { %v168_v17 = vmul.f32 0.70710677, %v162_v14  ;;  %v564_v18 = vpop.f32.mrb[3].mxu1  ;;  %v167_v20 = vmul.f32 0.5, %v162_v14  ;;  %v403_v14 = vld [vmem:[#allocation4 + $0x228] sm:$0xff]  ;;  %v404_v16 = vld [vmem:[#allocation4 + $0x230] sm:$0xff] }
 0x1eb   :  { %v489_v18 = vld [vmem:[#allocation4 + $0x13] ss:$0 sm:$0xff] }
 0x1ec   :  { %653 = verf.f32 %v168_v17  ;;  %v419_v17 = vpack.c.bf16 %v404_v16, %v403_v14 }
 0x1f6   :  { %v654_v19 = vpop.eup %653 }
 0x1f7   :  { %v170_v21 = vadd.f32 1.0, %v654_v19 }
 0x1f9   :  { %v171_v22 = vmul.f32 %v170_v21, %v167_v20 }
 0x1fb   :  { %v188_v23 = vpack.c.bf16 %v171_v22, %v171_v22 }
 0x1fd   :  { %582 = vmatmul.mubr.bf16.vlgmr.msra.gmra.mrb[4].mxu0 %v188_v23 }
 0x1fe   :  { %621 = vmatprep.mubr.msk.bf16.mxu0 %vm716_vm0, %v715_v0  ;;  %606 = vmatpush3.bf16.msra.mxu0 %v339_v42  ;;  %v413_v42 = vld [vmem:[#allocation4 + $0x278] sm:$0xff] }
 0x1ff   :  { %607 = vmatprep.subr.bf16.mxu0 %v715_v0 }
 0x202   :  { %608 = vmatpush3.bf16.msra.mxu0 %v340_v44  ;;  %v424_v44 = vpack.c.bf16 %v414_v43, %v413_v42 }
 0x203   :  { %609 = vmatprep.subr.bf16.mxu0 %v715_v0 }
 0x206   :  { %610 = vmatpush3.bf16.msra.mxu0 %v341_v47  ;;  %v425_v47 = vpack.c.bf16 %v416_v46, %v415_v45 }
 0x207   :  { %611 = vmatprep.subr.bf16.mxu0 %v715_v0 }
 0x20a   :  { %612 = vmatpush3.bf16.msra.mxu0 %v342_v62  ;;  %v491_v62 = vld [vmem:[#allocation4 + $0x15] ss:$0 sm:$0xff] }
 0x20b   :  { %613 = vmatprep.subr.bf16.mxu0 %v715_v0 }
 0x20e   :  { %614 = vmatpush3.bf16.msra.mxu0 %v343_v2 }
 0x20f   :  { %615 = vmatprep.subr.bf16.mxu0 %v715_v0 }
 0x212   :  { %616 = vmatpush3.bf16.msra.mxu0 %v344_v5 }
 0x213   :  { %617 = vmatprep.subr.bf16.mxu0 %v715_v0 }
 0x216   :  { %618 = vmatpush3.bf16.msra.mxu0 %v345_v8 }
 0x217   :  { %619 = vmatprep.subr.bf16.mxu0 %v715_v0 }
 0x21a   :  { %620 = vmatpush3.bf16.msra.mxu0 %v346_v11 }
 0x2d0   :  { %v236_v49 = vpop.f32.mrb[4].mxu0 }
 0x2d1   :  { %v237_v50 = vadd.f32 %v488_v48, %v236_v49  ;;  %v583_v51 = vpop.f32.mrb[5].mxu0  ;;  %v490_v48 = vld [vmem:[#allocation4 + $0x14] ss:$0 sm:$0xff] }
 0x2d2   :  { %v239_v52 = vpop.f32.mrb[6].mxu0 }
 0x2d3   :  { %v243_v53 = vmul.f32 0.70710677, %v237_v50  ;;  %v584_v54 = vpop.f32.mrb[7].mxu0  ;;  %v242_v56 = vmul.f32 0.5, %v237_v50 }
 0x2d5   :  { %655 = verf.f32 %v243_v53 }
 0x2df   :  { %v656_v55 = vpop.eup %655 }
 0x2e0   :  { %v245_v57 = vadd.f32 1.0, %v656_v55  ;;  %v397_v55 = vlaneseq }
 0x2e2   :  { %v246_v58 = vmul.f32 %v245_v57, %v242_v56  ;;  %v398_v56 = vand.u32 127, %v397_v55 }
 0x2e4   :  { %v263_v59 = vpack.c.bf16 %v246_v58, %v246_v58  ;;  %vm399_vm2 = vcmp.lt.s32.totalorder %v398_v56, 32  ;;  %vm475_vm3 = vcmp.eq.s32.totalorder %v398_v56, 1 }
 0x2e6   :  { %602 = vmatmul.mubr.bf16.vlgmr.msra.gmra.mrb[4].mxu1 %v263_v59 }
 0x2e7   :  { %641 = vmatprep.mubr.msk.bf16.mxu1 %vm716_vm0, %v715_v0  ;;  %626 = vmatpush3.bf16.msra.mxu1 %v418_v15 }
 0x2e8   :  { %627 = vmatprep.subr.bf16.mxu1 %v715_v0 }
 0x2eb   :  { %628 = vmatpush3.bf16.msra.mxu1 %v419_v17 }
 0x2ec   :  { %629 = vmatprep.subr.bf16.mxu1 %v715_v0 }
 0x2ef   :  { %630 = vmatpush3.bf16.msra.mxu1 %v420_v32 }
 0x2f0   :  { %631 = vmatprep.subr.bf16.mxu1 %v715_v0 }
 0x2f3   :  { %632 = vmatpush3.bf16.msra.mxu1 %v421_v35 }
 0x2f4   :  { %633 = vmatprep.subr.bf16.mxu1 %v715_v0 }
 0x2f7   :  { %634 = vmatpush3.bf16.msra.mxu1 %v422_v38 }
 0x2f8   :  { %635 = vmatprep.subr.bf16.mxu1 %v715_v0 }
 0x2fb   :  { %636 = vmatpush3.bf16.msra.mxu1 %v423_v41 }
 0x2fc   :  { %637 = vmatprep.subr.bf16.mxu1 %v715_v0 }
 0x2ff   :  { %638 = vmatpush3.bf16.msra.mxu1 %v424_v44 }
 0x300   :  { %639 = vmatprep.subr.bf16.mxu1 %v715_v0 }
 0x303   :  { %640 = vmatpush3.bf16.msra.mxu1 %v425_v47 }
 0x3b9   :  { %v311_v19 = vpop.f32.mrb[4].mxu1 }
 0x3ba   :  { %v312_v20 = vadd.f32 %v489_v18, %v311_v19  ;;  %v603_v21 = vpop.f32.mrb[5].mxu1 }
 0x3bb   :  { %v314_v22 = vpop.f32.mrb[6].mxu1 }
 0x3bc   :  { %v318_v23 = vmul.f32 0.70710677, %v312_v20  ;;  %v604_v24 = vpop.f32.mrb[7].mxu1  ;;  %v317_v26 = vmul.f32 0.5, %v312_v20 }
 0x3be   :  { %657 = verf.f32 %v318_v23 }
 0x3c8   :  { %v658_v25 = vpop.eup %657 }
 0x3c9   :  { %v320_v27 = vadd.f32 1.0, %v658_v25 }
 0x3cb   :  { %v321_v28 = vmul.f32 %v320_v27, %v317_v26 }
 0x3cd   :  { %v338_v29 = vpack.c.bf16 %v321_v28, %v321_v28 }
 0x3cf   :  { %622 = vmatmul.mubr.bf16.vlgmr.msra.gmra.mrb[8].mxu0 %v338_v29 }
 0x4a2   :  { %v386_v49 = vpop.f32.mrb[8].mxu0 }
 0x4a3   :  { %v387_v50 = vadd.f32 %v490_v48, %v386_v49  ;;  %v623_v51 = vpop.f32.mrb[9].mxu0 }
 0x4a4   :  { %v389_v52 = vpop.f32.mrb[10].mxu0 }
 0x4a5   :  { %v393_v53 = vmul.f32 0.70710677, %v387_v50  ;;  %v624_v54 = vpop.f32.mrb[11].mxu0  ;;  %v392_v58 = vmul.f32 0.5, %v387_v50 }
 0x4a7   :  { %659 = verf.f32 %v393_v53 }
 0x4b1   :  { %v660_v57 = vpop.eup %659 }
 0x4b2   :  { %v395_v59 = vadd.f32 1.0, %v660_v57 }
 0x4b4   :  { %v396_v60 = vmul.f32 %v395_v59, %v392_v58 }
 0x4b6   :  { %v400_v0 = vsel %vm399_vm2, %v321_v28, %v396_v60 }
 0x4b7   :  { %v417_v61 = vpack.c.bf16 %v400_v0, %v400_v0 }
 0x4b9   :  { %642 = vmatmul.mubr.bf16.vlgmr.msra.gmra.mrb[8].mxu1 %v417_v61 }
 0x58c   :  { %v465_v63 = vpop.f32.mrb[8].mxu1 }
 0x58d   :  { %v466_v1 = vadd.f32 %v491_v62, %v465_v63  ;;  %v643_v2 = vpop.f32.mrb[9].mxu1 }
 0x58e   :  { %v468_v3 = vpop.f32.mrb[10].mxu1 }
 0x58f   :  { %v471_v4 = vmax.f32 %v466_v1, -0.1  ;;  %v644_v5 = vpop.f32.mrb[11].mxu1 }
 0x591   :  { %v472_v6 = vmin.f32 %v471_v4, 5.0 }
 0x593   :  { %v473_v7 = vmul.f32 1.442695, %v472_v6 }
 0x595   :  { %661 = vpow2.f32 %v473_v7 }
 0x59f   :  { %v662_v8 = vpop.eup %661 }
 0x5a0   :  { %v476_v9 = vsel %vm475_vm3, %v662_v8, %v466_v1 }
 0x5a1   :  { %478 = vst.msk [vmem:[%s821_s2] sm:$0xff] %vm477_vm4, %v476_v9 }
 0x5a2   :  { %483 = vsyncpa [#allocation3], 1 }
 0x5a3   :  { %484 = vsyncpa [#allocation5], 1 }

// kernel: tpu_custom_call.1
= control target key start
LH: loop header
LB: loop body
LE: loop exit
PB: predicated region body
PF: predicated region fallthrough
CT: control target
= control target key end

     0   :  { %7 = vsyncpa [#allocation3], 0  ;;  %s819_s0 = inlined_call_operand.hbm [shape: f32[8,16], index: 0, kind: input, shape index: {}]   ;;  %s820_s1 = inlined_call_operand.hbm [shape: f32[664,128], index: 1, kind: input, shape index: {}]   ;;  %s821_s2 = inlined_call_operand.vmem [shape: f32[8,2], index: 2, kind: output, shape index: {}]  }
   0x1   :  { %8 = vsyncpa [#allocation5], 0  ;;  %s711_s9 = smov [#allocation2]   ;;  %s712_s11 = smov [#allocation4]  }
   0x2   :  { %s15_s10 = sshll.u32 %s711_s9, 4  ;;  %s24_s12 = sshll.u32 %s712_s11, 4  ;;  %s16_s10 = int_to_ptr.vmem [resolvable:$true] %s15_s10  ;;  %s732_s12 = int_to_ptr.vmem [resolvable:$true] %s24_s12 }
   0x3   :  { %s663_s15 = scalar_lea.hbm %s819_s0, 128 }
   0x4   :  { %p664_p0 = scmp.ne.s32.totalorder %s819_s0, %s663_s15  ;;  %p667_p1 = scmp.lt.u32.totalorder %s663_s15, %s819_s0 }
   0x6   :  { %p669_p2 = pnand %p667_p1, %p664_p0 }
   0x8   :  { %672 = shalt.err (!%p669_p2)
}
   0x9   :  { %s673_s20 = scalar_lea.vmem %s16_s10, 128  ;;  %p678_p4 = scmp.lt.s32.totalorder %s16_s10, %s16_s10 }
   0xa   :  { %p674_p3 = scmp.ne.s32.totalorder %s16_s10, %s673_s20  ;;  %p679_p5 = scmp.lt.s32.totalorder %s673_s20, %s673_s20 }
   0xc   :  { %p680_p6 = por %p679_p5, %p678_p4 }
   0xe   :  { %p681_p7 = pnand %p680_p6, %p674_p3 }
  0x10   :  { %684 = shalt.err (!%p681_p7)
}
  0x11   :  { %18 = dma.hbm_to_vmem [thread:$0]  %s819_s0, 128, %s16_s10, [#allocation3]  }
  0x12   :  { %s685_s25 = scalar_lea.hbm %s820_s1, 10624 }
  0x13   :  { %p686_p8 = scmp.ne.s32.totalorder %s820_s1, %s685_s25  ;;  %p689_p9 = scmp.lt.u32.totalorder %s685_s25, %s820_s1 }
  0x15   :  { %p691_p10 = pnand %p689_p9, %p686_p8 }
  0x17   :  { %694 = shalt.err (!%p691_p10)
}
  0x18   :  { %s695_s30 = scalar_lea.vmem %s732_s12, 10624  ;;  %p700_p12 = scmp.lt.s32.totalorder %s732_s12, %s732_s12 }
  0x19   :  { %p696_p11 = scmp.ne.s32.totalorder %s732_s12, %s695_s30  ;;  %p701_p13 = scmp.lt.s32.totalorder %s695_s30, %s695_s30 }
  0x1b   :  { %p702_p0 = por %p701_p13, %p700_p12 }
  0x1d   :  { %p703_p1 = pnand %p702_p0, %p696_p11 }
  0x1f   :  { %706 = shalt.err (!%p703_p1)
}
  0x20   :  { %s713_s0 = smov 128   ;;  %s714_s3 = smov 8  }
  0x21   :  { %30 = dma.hbm_to_vmem [thread:$0]  %s820_s1, 10624, %s732_s12, [#allocation5], %s713_s0, %s713_s0, %s714_s3  }
  0x22   :  { %707 = dma.done.wait [#allocation3], 128  }
  0x23   :  { %708 = vsyncadd [#allocation3], 4294967168 }
  0x24   :  { %709 = dma.done.wait [#allocation5], 10624  }
  0x25   :  { %710 = vsyncadd [#allocation5], 4294956672  ;;  %v715_v0 = vmov 0.0   ;;  %vm716_vm0 = vmmov 0   ;;  %v39_v1 = vld [vmem:[#allocation4] sm:$0xff]  ;;  %v40_v2 = vld [vmem:[#allocation4 + $0x8] sm:$0xff] }
  0x26   :  { %539 = vmatprep.subr.bf16.mxu0 %v715_v0  ;;  %541 = vmatprep.mubr.msk.bf16.mxu0 %vm716_vm0, %v715_v0  ;;  %v38_v3 = vld [vmem:[#allocation2] sm:$0xff]  ;;  %v42_v4 = vpack.c.bf16 %v40_v2, %v39_v1  ;;  %v98_v6 = vld [vmem:[#allocation4 + $0x20] sm:$0xff]  ;;  %v99_v7 = vld [vmem:[#allocation4 + $0x28] sm:$0xff]  ;;  %vm48_vm1 = vcmask 130048   ;;  %vm477_vm4 = vcmask 15360  }
  0x27   :  { %545 = vmatprep.subr.bf16.mxu1 %v715_v0  ;;  %561 = vmatprep.mubr.msk.bf16.mxu1 %vm716_vm0, %v715_v0  ;;  %v97_v5 = vld [vmem:[#allocation4 + $0x18] sm:$0xff]  ;;  %v41_v8 = vpack.c.bf16 %v38_v3, %v38_v3  ;;  %v100_v10 = vld [vmem:[#allocation4 + $0x30] sm:$0xff]  ;;  %v102_v13 = vld [vmem:[#allocation4 + $0x40] sm:$0xff] }
  0x28   :  { %v114_v9 = vpack.c.bf16 %v98_v6, %v97_v5  ;;  %540 = vmatpush3.bf16.msra.mxu0 %v42_v4  ;;  %v115_v11 = vpack.c.bf16 %v100_v10, %v99_v7  ;;  %v101_v12 = vld [vmem:[#allocation4 + $0x38] sm:$0xff]  ;;  %v103_v15 = vld [vmem:[#allocation4 + $0x48] sm:$0xff]  ;;  %v104_v16 = vld [vmem:[#allocation4 + $0x50] sm:$0xff] }
  0x29   :  { %565 = vmatprep.subr.bf16.mxu0 %v715_v0  ;;  %v116_v14 = vpack.c.bf16 %v102_v13, %v101_v12  ;;  %v117_v17 = vpack.c.bf16 %v104_v16, %v103_v15  ;;  %v105_v18 = vld [vmem:[#allocation4 + $0x58] sm:$0xff]  ;;  %v106_v19 = vld [vmem:[#allocation4 + $0x60] sm:$0xff]  ;;  %v107_v21 = vld [vmem:[#allocation4 + $0x68] sm:$0xff] }
  0x2a   :  { %546 = vmatpush3.bf16.msra.mxu1 %v114_v9  ;;  %v118_v20 = vpack.c.bf16 %v106_v19, %v105_v18  ;;  %v108_v22 = vld [vmem:[#allocation4 + $0x70] sm:$0xff]  ;;  %v109_v24 = vld [vmem:[#allocation4 + $0x78] sm:$0xff]  ;;  %v110_v25 = vld [vmem:[#allocation4 + $0x80] sm:$0xff] }
  0x2b   :  { %547 = vmatprep.subr.bf16.mxu1 %v715_v0  ;;  %542 = vmatmul.mubr.msk.bf16.vlgmr.msra.gmra.mrb[0].mxu0 %vm48_vm1, %v41_v8  ;;  %v119_v23 = vpack.c.bf16 %v108_v22, %v107_v21  ;;  %v120_v26 = vpack.c.bf16 %v110_v25, %v109_v24  ;;  %v111_v27 = vld [vmem:[#allocation4 + $0x88] sm:$0xff]  ;;  %v112_v28 = vld [vmem:[#allocation4 + $0x90] sm:$0xff]  ;;  %v172_v30 = vld [vmem:[#allocation4 + $0x98] sm:$0xff] }
  0x2c   :  { %581 = vmatprep.mubr.msk.bf16.mxu0 %vm716_vm0, %v715_v0  ;;  %v121_v29 = vpack.c.bf16 %v112_v28, %v111_v27  ;;  %v173_v31 = vld [vmem:[#allocation4 + $0xa0] sm:$0xff]  ;;  %v174_v32 = vld [vmem:[#allocation4 + $0xa8] sm:$0xff]  ;;  %v175_v34 = vld [vmem:[#allocation4 + $0xb0] sm:$0xff] }
  0x2d   :  { %v189_v33 = vpack.c.bf16 %v173_v31, %v172_v30  ;;  %v190_v35 = vpack.c.bf16 %v175_v34, %v174_v32  ;;  %v176_v36 = vld [vmem:[#allocation4 + $0xb8] sm:$0xff]  ;;  %v177_v37 = vld [vmem:[#allocation4 + $0xc0] sm:$0xff]  ;;  %v485_v39 = vld [vmem:[#allocation4 + $0x10] ss:$0 sm:$0xff] }
  0x2e   :  { %548 = vmatpush3.bf16.msra.mxu1 %v115_v11  ;;  %v191_v38 = vpack.c.bf16 %v177_v37, %v176_v36  ;;  %v178_v51 = vld [vmem:[#allocation4 + $0xc8] sm:$0xff]  ;;  %v179_v52 = vld [vmem:[#allocation4 + $0xd0] sm:$0xff]  ;;  %v180_v54 = vld [vmem:[#allocation4 + $0xd8] sm:$0xff] }
  0x2f   :  { %549 = vmatprep.subr.bf16.mxu1 %v715_v0  ;;  %566 = vmatpush3.bf16.msra.mxu0 %v189_v33  ;;  %v192_v53 = vpack.c.bf16 %v179_v52, %v178_v51  ;;  %v181_v55 = vld [vmem:[#allocation4 + $0xe0] sm:$0xff]  ;;  %v182_v57 = vld [vmem:[#allocation4 + $0xe8] sm:$0xff]  ;;  %v183_v58 = vld [vmem:[#allocation4 + $0xf0] sm:$0xff] }
  0x30   :  { %567 = vmatprep.subr.bf16.mxu0 %v715_v0  ;;  %v193_v56 = vpack.c.bf16 %v181_v55, %v180_v54  ;;  %v194_v59 = vpack.c.bf16 %v183_v58, %v182_v57  ;;  %v184_v60 = vld [vmem:[#allocation4 + $0xf8] sm:$0xff]  ;;  %v185_v61 = vld [vmem:[#allocation4 + $0x100] sm:$0xff]  ;;  %v186_v63 = vld [vmem:[#allocation4 + $0x108] sm:$0xff] }
  0x31   :  { %v195_v62 = vpack.c.bf16 %v185_v61, %v184_v60  ;;  %v187_v1 = vld [vmem:[#allocation4 + $0x110] sm:$0xff]  ;;  %v247_v3 = vld [vmem:[#allocation4 + $0x118] sm:$0xff]  ;;  %v248_v4 = vld [vmem:[#allocation4 + $0x120] sm:$0xff] }
  0x32   :  { %550 = vmatpush3.bf16.msra.mxu1 %v116_v14  ;;  %v196_v2 = vpack.c.bf16 %v187_v1, %v186_v63  ;;  %v249_v5 = vld [vmem:[#allocation4 + $0x128] sm:$0xff]  ;;  %v264_v6 = vpack.c.bf16 %v248_v4, %v247_v3  ;;  %v250_v7 = vld [vmem:[#allocation4 + $0x130] sm:$0xff]  ;;  %v251_v9 = vld [vmem:[#allocation4 + $0x138] sm:$0xff] }
  0x33   :  { %551 = vmatprep.subr.bf16.mxu1 %v715_v0  ;;  %568 = vmatpush3.bf16.msra.mxu0 %v190_v35  ;;  %v265_v8 = vpack.c.bf16 %v250_v7, %v249_v5  ;;  %v252_v10 = vld [vmem:[#allocation4 + $0x140] sm:$0xff]  ;;  %v487_v12 = vld [vmem:[#allocation4 + $0x11] ss:$0 sm:$0xff]  ;;  %v253_v24 = vld [vmem:[#allocation4 + $0x148] sm:$0xff] }
  0x34   :  { %569 = vmatprep.subr.bf16.mxu0 %v715_v0  ;;  %v266_v11 = vpack.c.bf16 %v252_v10, %v251_v9  ;;  %v254_v25 = vld [vmem:[#allocation4 + $0x150] sm:$0xff]  ;;  %v255_v27 = vld [vmem:[#allocation4 + $0x158] sm:$0xff]  ;;  %v256_v28 = vld [vmem:[#allocation4 + $0x160] sm:$0xff] }
  0x35   :  { %v257_v30 = vld [vmem:[#allocation4 + $0x168] sm:$0xff]  ;;  %v258_v31 = vld [vmem:[#allocation4 + $0x170] sm:$0xff]  ;;  %v259_v33 = vld [vmem:[#allocation4 + $0x178] sm:$0xff] }
  0x36   :  { %552 = vmatpush3.bf16.msra.mxu1 %v117_v17  ;;  %v269_v32 = vpack.c.bf16 %v258_v31, %v257_v30  ;;  %v260_v34 = vld [vmem:[#allocation4 + $0x180] sm:$0xff]  ;;  %v261_v36 = vld [vmem:[#allocation4 + $0x188] sm:$0xff]  ;;  %v262_v37 = vld [vmem:[#allocation4 + $0x190] sm:$0xff] }
  0x37   :  { %553 = vmatprep.subr.bf16.mxu1 %v715_v0  ;;  %570 = vmatpush3.bf16.msra.mxu0 %v191_v38  ;;  %v270_v35 = vpack.c.bf16 %v260_v34, %v259_v33  ;;  %v271_v38 = vpack.c.bf16 %v262_v37, %v261_v36  ;;  %v328_v60 = vld [vmem:[#allocation4 + $0x1c8] sm:$0xff]  ;;  %v329_v61 = vld [vmem:[#allocation4 + $0x1d0] sm:$0xff]  ;;  %v330_v63 = vld [vmem:[#allocation4 + $0x1d8] sm:$0xff] }
  0x38   :  { %571 = vmatprep.subr.bf16.mxu0 %v715_v0  ;;  %v331_v1 = vld [vmem:[#allocation4 + $0x1e0] sm:$0xff]  ;;  %v332_v3 = vld [vmem:[#allocation4 + $0x1e8] sm:$0xff]  ;;  %v333_v4 = vld [vmem:[#allocation4 + $0x1f0] sm:$0xff] }
  0x39   :  { %v344_v5 = vpack.c.bf16 %v333_v4, %v332_v3  ;;  %v335_v7 = vld [vmem:[#allocation4 + $0x200] sm:$0xff]  ;;  %v336_v9 = vld [vmem:[#allocation4 + $0x208] sm:$0xff]  ;;  %v337_v10 = vld [vmem:[#allocation4 + $0x210] sm:$0xff] }
  0x3a   :  { %554 = vmatpush3.bf16.msra.mxu1 %v118_v20  ;;  %v405_v30 = vld [vmem:[#allocation4 + $0x238] sm:$0xff]  ;;  %v406_v31 = vld [vmem:[#allocation4 + $0x240] sm:$0xff]  ;;  %v407_v33 = vld [vmem:[#allocation4 + $0x248] sm:$0xff] }
  0x3b   :  { %555 = vmatprep.subr.bf16.mxu1 %v715_v0  ;;  %572 = vmatpush3.bf16.msra.mxu0 %v192_v53  ;;  %v408_v34 = vld [vmem:[#allocation4 + $0x250] sm:$0xff]  ;;  %v409_v36 = vld [vmem:[#allocation4 + $0x258] sm:$0xff]  ;;  %v410_v37 = vld [vmem:[#allocation4 + $0x260] sm:$0xff] }
  0x3c   :  { %573 = vmatprep.subr.bf16.mxu0 %v715_v0 }
  0x3e   :  { %556 = vmatpush3.bf16.msra.mxu1 %v119_v23 }
  0x3f   :  { %557 = vmatprep.subr.bf16.mxu1 %v715_v0  ;;  %574 = vmatpush3.bf16.msra.mxu0 %v193_v56 }
  0x40   :  { %575 = vmatprep.subr.bf16.mxu0 %v715_v0 }
  0x42   :  { %558 = vmatpush3.bf16.msra.mxu1 %v120_v26  ;;  %v267_v26 = vpack.c.bf16 %v254_v25, %v253_v24 }
  0x43   :  { %559 = vmatprep.subr.bf16.mxu1 %v715_v0  ;;  %576 = vmatpush3.bf16.msra.mxu0 %v194_v59 }
  0x44   :  { %577 = vmatprep.subr.bf16.mxu0 %v715_v0 }
  0x46   :  { %560 = vmatpush3.bf16.msra.mxu1 %v121_v29  ;;  %v268_v29 = vpack.c.bf16 %v256_v28, %v255_v27 }
  0x47   :  { %585 = vmatprep.subr.bf16.mxu1 %v715_v0  ;;  %578 = vmatpush3.bf16.msra.mxu0 %v195_v62  ;;  %v342_v62 = vpack.c.bf16 %v329_v61, %v328_v60 }
  0x48   :  { %579 = vmatprep.subr.bf16.mxu0 %v715_v0 }
  0x4b   :  { %580 = vmatpush3.bf16.msra.mxu0 %v196_v2  ;;  %v343_v2 = vpack.c.bf16 %v331_v1, %v330_v63 }
  0x4c   :  { %605 = vmatprep.subr.bf16.mxu0 %v715_v0 }
  0xfe   :  { %v86_v40 = vpop.f32.mrb[0].mxu0 }
  0xff   :  { %v87_v41 = vadd.f32 %v485_v39, %v86_v40  ;;  %v543_v42 = vpop.f32.mrb[1].mxu0  ;;  %v322_v39 = vld [vmem:[#allocation4 + $0x198] sm:$0xff]  ;;  %v323_v40 = vld [vmem:[#allocation4 + $0x1a0] sm:$0xff] }
 0x100   :  { %v89_v43 = vpop.f32.mrb[2].mxu0  ;;  %v339_v42 = vpack.c.bf16 %v323_v40, %v322_v39  ;;  %v411_v39 = vld [vmem:[#allocation4 + $0x268] sm:$0xff]  ;;  %v412_v40 = vld [vmem:[#allocation4 + $0x270] sm:$0xff] }
 0x101   :  { %v93_v44 = vmul.f32 0.70710677, %v87_v41  ;;  %v544_v45 = vpop.f32.mrb[3].mxu0  ;;  %v92_v47 = vmul.f32 0.5, %v87_v41  ;;  %v324_v41 = vld [vmem:[#allocation4 + $0x1a8] sm:$0xff]  ;;  %v325_v43 = vld [vmem:[#allocation4 + $0x1b0] sm:$0xff] }
 0x102   :  { %v326_v45 = vld [vmem:[#allocation4 + $0x1b8] sm:$0xff] }
 0x103   :  { %651 = verf.f32 %v93_v44  ;;  %v340_v44 = vpack.c.bf16 %v325_v43, %v324_v41  ;;  %v423_v41 = vpack.c.bf16 %v412_v40, %v411_v39  ;;  %v414_v43 = vld [vmem:[#allocation4 + $0x280] sm:$0xff] }
 0x10d   :  { %v652_v46 = vpop.eup %651 }
 0x10e   :  { %v95_v48 = vadd.f32 1.0, %v652_v46  ;;  %v327_v46 = vld [vmem:[#allocation4 + $0x1c0] sm:$0xff] }
 0x110   :  { %v96_v49 = vmul.f32 %v95_v48, %v92_v47  ;;  %v341_v47 = vpack.c.bf16 %v327_v46, %v326_v45  ;;  %v488_v48 = vld [vmem:[#allocation4 + $0x12] ss:$0 sm:$0xff]  ;;  %v415_v45 = vld [vmem:[#allocation4 + $0x288] sm:$0xff] }
 0x111   :  { %v416_v46 = vld [vmem:[#allocation4 + $0x290] sm:$0xff] }
 0x112   :  { %v113_v50 = vpack.c.bf16 %v96_v49, %v96_v49 }
 0x114   :  { %562 = vmatmul.mubr.bf16.vlgmr.msra.gmra.mrb[0].mxu1 %v113_v50 }
 0x115   :  { %601 = vmatprep.mubr.msk.bf16.mxu1 %vm716_vm0, %v715_v0  ;;  %586 = vmatpush3.bf16.msra.mxu1 %v264_v6  ;;  %v334_v6 = vld [vmem:[#allocation4 + $0x1f8] sm:$0xff] }
 0x116   :  { %587 = vmatprep.subr.bf16.mxu1 %v715_v0 }
 0x119   :  { %588 = vmatpush3.bf16.msra.mxu1 %v265_v8  ;;  %v345_v8 = vpack.c.bf16 %v335_v7, %v334_v6 }
 0x11a   :  { %589 = vmatprep.subr.bf16.mxu1 %v715_v0 }
 0x11d   :  { %590 = vmatpush3.bf16.msra.mxu1 %v266_v11  ;;  %v346_v11 = vpack.c.bf16 %v337_v10, %v336_v9 }
 0x11e   :  { %591 = vmatprep.subr.bf16.mxu1 %v715_v0 }
 0x121   :  { %592 = vmatpush3.bf16.msra.mxu1 %v267_v26 }
 0x122   :  { %593 = vmatprep.subr.bf16.mxu1 %v715_v0 }
 0x125   :  { %594 = vmatpush3.bf16.msra.mxu1 %v268_v29 }
 0x126   :  { %595 = vmatprep.subr.bf16.mxu1 %v715_v0 }
 0x129   :  { %596 = vmatpush3.bf16.msra.mxu1 %v269_v32  ;;  %v420_v32 = vpack.c.bf16 %v406_v31, %v405_v30 }
 0x12a   :  { %597 = vmatprep.subr.bf16.mxu1 %v715_v0 }
 0x12d   :  { %598 = vmatpush3.bf16.msra.mxu1 %v270_v35  ;;  %v421_v35 = vpack.c.bf16 %v408_v34, %v407_v33 }
 0x12e   :  { %599 = vmatprep.subr.bf16.mxu1 %v715_v0 }
 0x131   :  { %600 = vmatpush3.bf16.msra.mxu1 %v271_v38  ;;  %v422_v38 = vpack.c.bf16 %v410_v37, %v409_v36 }
 0x132   :  { %625 = vmatprep.subr.bf16.mxu1 %v715_v0 }
 0x1e7   :  { %v161_v13 = vpop.f32.mrb[0].mxu1 }
 0x1e8   :  { %v162_v14 = vadd.f32 %v487_v12, %v161_v13  ;;  %v563_v15 = vpop.f32.mrb[1].mxu1  ;;  %v401_v12 = vld [vmem:[#allocation4 + $0x218] sm:$0xff]  ;;  %v402_v13 = vld [vmem:[#allocation4 + $0x220] sm:$0xff] }
 0x1e9   :  { %v164_v16 = vpop.f32.mrb[2].mxu1  ;;  %v418_v15 = vpack.c.bf16 %v402_v13, %v401_v12 }
 0x1ea   :  { %v168_v17 = vmul.f32 0.70710677, %v162_v14  ;;  %v564_v18 = vpop.f32.mrb[3].mxu1  ;;  %v167_v20 = vmul.f32 0.5, %v162_v14  ;;  %v403_v14 = vld [vmem:[#allocation4 + $0x228] sm:$0xff]  ;;  %v404_v16 = vld [vmem:[#allocation4 + $0x230] sm:$0xff] }
 0x1eb   :  { %v489_v18 = vld [vmem:[#allocation4 + $0x13] ss:$0 sm:$0xff] }
 0x1ec   :  { %653 = verf.f32 %v168_v17  ;;  %v419_v17 = vpack.c.bf16 %v404_v16, %v403_v14 }
 0x1f6   :  { %v654_v19 = vpop.eup %653 }
 0x1f7   :  { %v170_v21 = vadd.f32 1.0, %v654_v19 }
 0x1f9   :  { %v171_v22 = vmul.f32 %v170_v21, %v167_v20 }
 0x1fb   :  { %v188_v23 = vpack.c.bf16 %v171_v22, %v171_v22 }
 0x1fd   :  { %582 = vmatmul.mubr.bf16.vlgmr.msra.gmra.mrb[4].mxu0 %v188_v23 }
 0x1fe   :  { %621 = vmatprep.mubr.msk.bf16.mxu0 %vm716_vm0, %v715_v0  ;;  %606 = vmatpush3.bf16.msra.mxu0 %v339_v42  ;;  %v413_v42 = vld [vmem:[#allocation4 + $0x278] sm:$0xff] }
 0x1ff   :  { %607 = vmatprep.subr.bf16.mxu0 %v715_v0 }
 0x202   :  { %608 = vmatpush3.bf16.msra.mxu0 %v340_v44  ;;  %v424_v44 = vpack.c.bf16 %v414_v43, %v413_v42 }
 0x203   :  { %609 = vmatprep.subr.bf16.mxu0 %v715_v0 }
 0x206   :  { %610 = vmatpush3.bf16.msra.mxu0 %v341_v47  ;;  %v425_v47 = vpack.c.bf16 %v416_v46, %v415_v45 }
 0x207   :  { %611 = vmatprep.subr.bf16.mxu0 %v715_v0 }
 0x20a   :  { %612 = vmatpush3.bf16.msra.mxu0 %v342_v62  ;;  %v491_v62 = vld [vmem:[#allocation4 + $0x15] ss:$0 sm:$0xff] }
 0x20b   :  { %613 = vmatprep.subr.bf16.mxu0 %v715_v0 }
 0x20e   :  { %614 = vmatpush3.bf16.msra.mxu0 %v343_v2 }
 0x20f   :  { %615 = vmatprep.subr.bf16.mxu0 %v715_v0 }
 0x212   :  { %616 = vmatpush3.bf16.msra.mxu0 %v344_v5 }
 0x213   :  { %617 = vmatprep.subr.bf16.mxu0 %v715_v0 }
 0x216   :  { %618 = vmatpush3.bf16.msra.mxu0 %v345_v8 }
 0x217   :  { %619 = vmatprep.subr.bf16.mxu0 %v715_v0 }
 0x21a   :  { %620 = vmatpush3.bf16.msra.mxu0 %v346_v11 }
 0x2d0   :  { %v236_v49 = vpop.f32.mrb[4].mxu0 }
 0x2d1   :  { %v237_v50 = vadd.f32 %v488_v48, %v236_v49  ;;  %v583_v51 = vpop.f32.mrb[5].mxu0  ;;  %v490_v48 = vld [vmem:[#allocation4 + $0x14] ss:$0 sm:$0xff] }
 0x2d2   :  { %v239_v52 = vpop.f32.mrb[6].mxu0 }
 0x2d3   :  { %v243_v53 = vmul.f32 0.70710677, %v237_v50  ;;  %v584_v54 = vpop.f32.mrb[7].mxu0  ;;  %v242_v56 = vmul.f32 0.5, %v237_v50 }
 0x2d5   :  { %655 = verf.f32 %v243_v53 }
 0x2df   :  { %v656_v55 = vpop.eup %655 }
 0x2e0   :  { %v245_v57 = vadd.f32 1.0, %v656_v55  ;;  %v397_v55 = vlaneseq }
 0x2e2   :  { %v246_v58 = vmul.f32 %v245_v57, %v242_v56  ;;  %v398_v56 = vand.u32 127, %v397_v55 }
 0x2e4   :  { %v263_v59 = vpack.c.bf16 %v246_v58, %v246_v58  ;;  %vm399_vm2 = vcmp.lt.s32.totalorder %v398_v56, 32  ;;  %vm475_vm3 = vcmp.eq.s32.totalorder %v398_v56, 1 }
 0x2e6   :  { %602 = vmatmul.mubr.bf16.vlgmr.msra.gmra.mrb[4].mxu1 %v263_v59 }
 0x2e7   :  { %641 = vmatprep.mubr.msk.bf16.mxu1 %vm716_vm0, %v715_v0  ;;  %626 = vmatpush3.bf16.msra.mxu1 %v418_v15 }
 0x2e8   :  { %627 = vmatprep.subr.bf16.mxu1 %v715_v0 }
 0x2eb   :  { %628 = vmatpush3.bf16.msra.mxu1 %v419_v17 }
 0x2ec   :  { %629 = vmatprep.subr.bf16.mxu1 %v715_v0 }
 0x2ef   :  { %630 = vmatpush3.bf16.msra.mxu1 %v420_v32 }
 0x2f0   :  { %631 = vmatprep.subr.bf16.mxu1 %v715_v0 }
 0x2f3   :  { %632 = vmatpush3.bf16.msra.mxu1 %v421_v35 }
 0x2f4   :  { %633 = vmatprep.subr.bf16.mxu1 %v715_v0 }
 0x2f7   :  { %634 = vmatpush3.bf16.msra.mxu1 %v422_v38 }
 0x2f8   :  { %635 = vmatprep.subr.bf16.mxu1 %v715_v0 }
 0x2fb   :  { %636 = vmatpush3.bf16.msra.mxu1 %v423_v41 }
 0x2fc   :  { %637 = vmatprep.subr.bf16.mxu1 %v715_v0 }
 0x2ff   :  { %638 = vmatpush3.bf16.msra.mxu1 %v424_v44 }
 0x300   :  { %639 = vmatprep.subr.bf16.mxu1 %v715_v0 }
 0x303   :  { %640 = vmatpush3.bf16.msra.mxu1 %v425_v47 }
 0x3b9   :  { %v311_v19 = vpop.f32.mrb[4].mxu1 }
 0x3ba   :  { %v312_v20 = vadd.f32 %v489_v18, %v311_v19  ;;  %v603_v21 = vpop.f32.mrb[5].mxu1 }
 0x3bb   :  { %v314_v22 = vpop.f32.mrb[6].mxu1 }
 0x3bc   :  { %v318_v23 = vmul.f32 0.70710677, %v312_v20  ;;  %v604_v24 = vpop.f32.mrb[7].mxu1  ;;  %v317_v26 = vmul.f32 0.5, %v312_v20 }
 0x3be   :  { %657 = verf.f32 %v318_v23 }
 0x3c8   :  { %v658_v25 = vpop.eup %657 }
 0x3c9   :  { %v320_v27 = vadd.f32 1.0, %v658_v25 }
 0x3cb   :  { %v321_v28 = vmul.f32 %v320_v27, %v317_v26 }
 0x3cd   :  { %v338_v29 = vpack.c.bf16 %v321_v28, %v321_v28 }
 0x3cf   :  { %622 = vmatmul.mubr.bf16.vlgmr.msra.gmra.mrb[8].mxu0 %v338_v29 }
 0x4a2   :  { %v386_v49 = vpop.f32.mrb[8].mxu0 }
 0x4a3   :  { %v387_v50 = vadd.f32 %v490_v48, %v386_v49  ;;  %v623_v51 = vpop.f32.mrb[9].mxu0 }
 0x4a4   :  { %v389_v52 = vpop.f32.mrb[10].mxu0 }
 0x4a5   :  { %v393_v53 = vmul.f32 0.70710677, %v387_v50  ;;  %v624_v54 = vpop.f32.mrb[11].mxu0  ;;  %v392_v58 = vmul.f32 0.5, %v387_v50 }
 0x4a7   :  { %659 = verf.f32 %v393_v53 }
 0x4b1   :  { %v660_v57 = vpop.eup %659 }
 0x4b2   :  { %v395_v59 = vadd.f32 1.0, %v660_v57 }
 0x4b4   :  { %v396_v60 = vmul.f32 %v395_v59, %v392_v58 }
 0x4b6   :  { %v400_v0 = vsel %vm399_vm2, %v321_v28, %v396_v60 }
 0x4b7   :  { %v417_v61 = vpack.c.bf16 %v400_v0, %v400_v0 }
 0x4b9   :  { %642 = vmatmul.mubr.bf16.vlgmr.msra.gmra.mrb[8].mxu1 %v417_v61 }
 0x58c   :  { %v465_v63 = vpop.f32.mrb[8].mxu1 }
 0x58d   :  { %v466_v1 = vadd.f32 %v491_v62, %v465_v63  ;;  %v643_v2 = vpop.f32.mrb[9].mxu1 }
 0x58e   :  { %v468_v3 = vpop.f32.mrb[10].mxu1 }
 0x58f   :  { %v471_v4 = vmax.f32 %v466_v1, -0.1  ;;  %v644_v5 = vpop.f32.mrb[11].mxu1 }
 0x591   :  { %v472_v6 = vmin.f32 %v471_v4, 5.0 }
 0x593   :  { %v473_v7 = vmul.f32 1.442695, %v472_v6 }
 0x595   :  { %661 = vpow2.f32 %v473_v7 }
 0x59f   :  { %v662_v8 = vpop.eup %661 }
 0x5a0   :  { %v476_v9 = vsel %vm475_vm3, %v662_v8, %v466_v1 }
 0x5a1   :  { %478 = vst.msk [vmem:[%s821_s2] sm:$0xff] %vm477_vm4, %v476_v9 }
 0x5a2   :  { %483 = vsyncpa [#allocation3], 1 }
 0x5a3   :  { %484 = vsyncpa [#allocation5], 1 }

</bundles_post_ra>
